<compile_context>
chip_gen: v7x
topology: tpu7x:2x2x1
jax: 0.10.0
libtpu: 0.0.40
codegen_flags: <defaults>
</compile_context>

<pallas_src>
import functools
import math

import jax
import jax.numpy as jnp
from jax.experimental import pallas as pl
from jax.experimental.pallas import tpu as pltpu

KS = (39, 19, 9)          # Inception kernel sizes (ks=40 -> [39, 19, 9])
BN_EPS = 1e-5
VMEM_LIMIT = 48 * 1024 * 1024   # explicit scoped-VMEM budget (safe on v5e/v6e/v7x)


# ---------------------------------------------------------------------------
# Pallas kernels
# ---------------------------------------------------------------------------
def _inception_kernel(xpad_ref, wb_ref, wmp_ref, wbr_ref,
                      sbr_ref, hbr_ref, smp_ref, hmp_ref,
                      br_ref, mp_ref, *, L, taps):
    """One grid step = one batch element.

    xpad_ref : (1, L + taps-1, c_in)  f32 input, zero-padded in time by taps//2
    wb_ref   : (c_in, H*nf)           bf16 bottleneck 1x1 conv (heads folded)
    wmp_ref  : (c_in, H*nf)           bf16 maxpool-branch 1x1 conv
    wbr_ref  : (taps, H*nf, H*3*nf)   bf16 branch convs (39/19/9 folded over taps,
                                           block-diagonal over heads)
    sbr/hbr  : (1, H*3*nf)  f32 folded BN scale/shift for the conv branches
    smp/hmp  : (1, H*nf)    f32 folded BN scale/shift for the maxpool branch
    br_ref   : (1, L, H*3*nf) bf16 output (per head: [k39 | k19 | k9] * nf)
    mp_ref   : (1, L, H*nf)   bf16 output (per head: maxpool branch)
    """
    pad = taps // 2
    xpad = xpad_ref[0]                                   # (L+2P, c_in) f32

    # ---- bottleneck 1x1 conv for every head at once (keep padded rows: the
    #      zero pad of x maps to a zero pad of the bottleneck output). ----
    bott = jnp.dot(xpad.astype(jnp.bfloat16), wb_ref[...],
                   preferred_element_type=jnp.float32)   # (L+2P, H*nf) f32
    bott = bott.astype(jnp.bfloat16)

    # ---- 39/19/9 "same" convs: accumulate taps in f32 (no im2col). ----
    n_br = wbr_ref.shape[2]
    acc = jnp.zeros((L, n_br), jnp.float32)
    for k in range(taps):
        acc = acc + jnp.dot(bott[k:k + L, :], wbr_ref[k],
                            preferred_element_type=jnp.float32)
    ybr = acc * sbr_ref[...] + hbr_ref[...]
    br_ref[0] = jnp.maximum(ybr, 0.0).astype(br_ref.dtype)

    # ---- MaxPool1d(3, 1, 1) -> 1x1 conv branch.  Neighbours are slices of the
    #      already-padded input; boundary rows keep their own value (== the
    #      -inf-padding semantics, since max(a, a) == a). ----
    xc = xpad[pad:pad + L, :]
    xm1 = xpad[pad - 1:pad - 1 + L, :]
    xp1 = xpad[pad + 1:pad + 1 + L, :]
    t = jax.lax.broadcasted_iota(jnp.int32, (L, 1), 0)
    xm1 = jnp.where(t == 0, xc, xm1)
    xp1 = jnp.where(t == L - 1, xc, xp1)
    xm = jnp.maximum(jnp.maximum(xc, xm1), xp1)
    ymp = jnp.dot(xm.astype(jnp.bfloat16), wmp_ref[...],
                  preferred_element_type=jnp.float32)
    ymp = ymp * smp_ref[...] + hmp_ref[...]
    mp_ref[0] = jnp.maximum(ymp, 0.0).astype(mp_ref.dtype)


def _attention_kernel(q_ref, k_ref, v_ref, o_ref, w_ref, *, scale):
    """One grid step = T (head*batch) items: softmax(q k^T * scale) @ v."""
    q = q_ref[...]                                        # (T, L, dh) bf16
    k = k_ref[...]
    v = v_ref[...]
    s = jnp.einsum("bqd,bkd->bqk", q, k,
                   preferred_element_type=jnp.float32) * scale
    s = s - jnp.max(s, axis=-1, keepdims=True)
    e = jnp.exp(s)
    inv = pl.reciprocal(jnp.sum(e, axis=-1, keepdims=True), approx=True)
    p = e * inv                                           # f32 probabilities
    o_ref[...] = jnp.einsum("bqk,bkd->bqd", p.astype(v.dtype), v,
                            preferred_element_type=jnp.float32).astype(o_ref.dtype)
    w_ref[...] = p


def _conv1d_same_kernel(xpad_ref, w_ref, b_ref, o_ref, *, L, taps):
    """Conv1dSame(ks=taps) with bias; one grid step = one batch element."""
    x = xpad_ref[0]                                       # (L+taps-1, C) bf16
    n = w_ref.shape[2]
    acc = jnp.zeros((L, n), jnp.float32)
    for k in range(taps):
        acc = acc + jnp.dot(x[k:k + L, :], w_ref[k],
                            preferred_element_type=jnp.float32)
    o_ref[0] = (acc + b_ref[...]).astype(o_ref.dtype)


# ---------------------------------------------------------------------------
# Wrappers (pallas_call plumbing)
# ---------------------------------------------------------------------------
def inception_branch(x_ncl, p, *, num_heads, nf):
    """Run the num_heads InceptionModules of one branch (wq / wk / wv).

    x_ncl: (B, c_in, L) -> (H*B, L, 4*nf), row index h*B + b (matches
    torch.cat(x.chunk(H, dim=1), dim=0).transpose(-1, -2)).
    """
    B, c_in, L = x_ncl.shape
    H = num_heads
    taps = KS[0]
    P = taps // 2
    x = jnp.transpose(x_ncl, (0, 2, 1)).astype(jnp.float32)      # (B, L, c_in)
    xpad = jnp.pad(x, ((0, 0), (P, P), (0, 0)))                   # (B, L+2P, c_in)

    br, mp = pl.pallas_call(
        functools.partial(_inception_kernel, L=L, taps=taps),
        out_shape=(jax.ShapeDtypeStruct((B, L, H * 3 * nf), jnp.bfloat16),
                   jax.ShapeDtypeStruct((B, L, H * nf), jnp.bfloat16)),
        grid=(B,),
        in_specs=[
            pl.BlockSpec((1, L + 2 * P, c_in), lambda b: (b, 0, 0)),
            pl.BlockSpec((c_in, H * nf), lambda b: (0, 0)),
            pl.BlockSpec((c_in, H * nf), lambda b: (0, 0)),
            pl.BlockSpec((taps, H * nf, H * 3 * nf), lambda b: (0, 0, 0)),
            pl.BlockSpec((1, H * 3 * nf), lambda b: (0, 0)),
            pl.BlockSpec((1, H * 3 * nf), lambda b: (0, 0)),
            pl.BlockSpec((1, H * nf), lambda b: (0, 0)),
            pl.BlockSpec((1, H * nf), lambda b: (0, 0)),
        ],
        out_specs=(pl.BlockSpec((1, L, H * 3 * nf), lambda b: (b, 0, 0)),
                   pl.BlockSpec((1, L, H * nf), lambda b: (b, 0, 0))),
        compiler_params=pltpu.CompilerParams(
            dimension_semantics=("parallel",), vmem_limit_bytes=VMEM_LIMIT),
    )(xpad, p["wb"], p["wmp"], p["wbr"], p["sbr"], p["hbr"], p["smp"], p["hmp"])

    # Assemble per-head channels [k39, k19, k9, maxpool] and go head-major.
    br = br.reshape(B, L, H, 3 * nf)
    mp = mp.reshape(B, L, H, nf)
    full = jnp.concatenate([br, mp], axis=-1)            # (B, L, H, 4nf)
    return full.transpose(2, 0, 1, 3).reshape(H * B, L, 4 * nf)


def _pick_attn_block(HB, L, dh, budget=16 * 1024 * 1024):
    """Largest T in {16,8,4,2,1} dividing HB whose double-buffered blocks fit."""
    per_item = 2 * (4 * L * dh * 2 + L * L * 4)
    for t in (16, 8, 4, 2, 1):
        if HB % t == 0 and t * per_item <= budget:
            return t
    return 1


def attention(q, k, v):
    """q, k, v: (H*B, L, dh) bf16 -> (out (H*B, L, dh) bf16, weights (H*B, L, L) f32)."""
    HB, L, dh = q.shape
    scale = 1.0 / math.sqrt(dh)
    T = _pick_attn_block(HB, L, dh)
    return pl.pallas_call(
        functools.partial(_attention_kernel, scale=scale),
        out_shape=(jax.ShapeDtypeStruct((HB, L, dh), jnp.bfloat16),
                   jax.ShapeDtypeStruct((HB, L, L), jnp.float32)),
        grid=(HB // T,),
        in_specs=[pl.BlockSpec((T, L, dh), lambda i: (i, 0, 0))] * 3,
        out_specs=(pl.BlockSpec((T, L, dh), lambda i: (i, 0, 0)),
                   pl.BlockSpec((T, L, L), lambda i: (i, 0, 0))),
        compiler_params=pltpu.CompilerParams(
            dimension_semantics=("parallel",), vmem_limit_bytes=VMEM_LIMIT),
    )(q, k, v)


def final_conv(merged, wf, bf):
    """Conv1dSame(c_out -> d_model, ks=3, bias).  merged: (B, L, c_out) bf16."""
    B, L, c_out = merged.shape
    d_model = wf.shape[2]
    xpad = jnp.pad(merged, ((0, 0), (1, 1), (0, 0)))
    return pl.pallas_call(
        functools.partial(_conv1d_same_kernel, L=L, taps=3),
        out_shape=jax.ShapeDtypeStruct((B, L, d_model), jnp.float32),
        grid=(B,),
        in_specs=[
            pl.BlockSpec((1, L + 2, c_out), lambda b: (b, 0, 0)),
            pl.BlockSpec((3, c_out, d_model), lambda b: (0, 0, 0)),
            pl.BlockSpec((1, d_model), lambda b: (0, 0)),
        ],
        out_specs=pl.BlockSpec((1, L, d_model), lambda b: (b, 0, 0)),
        compiler_params=pltpu.CompilerParams(
            dimension_semantics=("parallel",), vmem_limit_bytes=VMEM_LIMIT),
    )(xpad, wf, bf.reshape(1, d_model))


def inception_self_atten(q_ncl, k_ncl, v_ncl, params, *, num_heads):
    B, _, L = q_ncl.shape
    H = num_heads
    nf = params["wq"]["smp"].shape[1] // H

    qh = inception_branch(q_ncl, params["wq"], num_heads=H, nf=nf)   # (H*B, L, 4nf)
    kh = inception_branch(k_ncl, params["wk"], num_heads=H, nf=nf)
    vh = inception_branch(v_ncl, params["wv"], num_heads=H, nf=nf)

    attn_out, attn_w = attention(qh, kh, vh)             # (H*B, L, dh), (H*B, L, L)

    dh = 4 * nf
    # torch.cat(chunk(dim=0), dim=-1): head-major rows -> channel-major columns
    merged = attn_out.reshape(H, B, L, dh).transpose(1, 2, 0, 3).reshape(B, L, H * dh)

    out = final_conv(merged, params["wf"], params["bf"])  # (B, L, d_model) f32
    return out.transpose(0, 2, 1), attn_w                 # back to NCL


# ---------------------------------------------------------------------------
# Deterministic synthetic parameters (shapes follow the torch module's __init__),
# pre-packed into the lane-dense / tap-folded layouts the kernels expect.
# ---------------------------------------------------------------------------
def _pack_inception(wb, wc, wmp, scale, shift, *, c_in, nf, H):
    # 1x1 convs with heads folded into lanes: (c_in, H*nf)
    Wb = jnp.transpose(wb, (1, 0, 2)).reshape(c_in, H * nf)
    Wmp = jnp.transpose(wmp, (1, 0, 2)).reshape(c_in, H * nf)
    # branch convs: zero-padded taps (19/9 centred in the 39 window),
    # block-diagonal over heads -> one lane-dense matmul weight.
    Wbr = jnp.zeros((KS[0], H * nf, H * 3 * nf), jnp.float32)
    for bi, K in enumerate(KS):
        off = (KS[0] - K) // 2
        for h in range(H):
            Wbr = Wbr.at[off:off + K,
                         h * nf:(h + 1) * nf,
                         h * 3 * nf + bi * nf:h * 3 * nf + (bi + 1) * nf].set(wc[K][h])
    sbr = scale[:, :3 * nf].reshape(1, H * 3 * nf)
    hbr = shift[:, :3 * nf].reshape(1, H * 3 * nf)
    smp = scale[:, 3 * nf:].reshape(1, H * nf)
    hmp = shift[:, 3 * nf:].reshape(1, H * nf)
    return dict(wb=Wb.astype(jnp.bfloat16), wmp=Wmp.astype(jnp.bfloat16),
                wbr=Wbr.astype(jnp.bfloat16),
                sbr=sbr, hbr=hbr, smp=smp, hmp=hmp)


def _init_inception(key, c_in, nf, H):
    ks = jax.random.split(key, 9)

    def nrm(k, shape, fan_in):
        return jax.random.normal(k, shape, jnp.float32) / jnp.sqrt(float(fan_in))

    wb = nrm(ks[0], (H, c_in, nf), c_in)                       # Conv1d(c_in->nf, 1)
    wc = {K: nrm(ki, (H, K, nf, nf), K * nf)                   # Conv1d(nf->nf, K) [k,ci,co]
          for K, ki in zip(KS, ks[1:4])}
    wmp = nrm(ks[4], (H, c_in, nf), c_in)                      # Conv1d(c_in->nf, 1)
    # BatchNorm1d(4*nf), eval mode, folded to per-channel scale/shift.
    gamma = 1.0 + 0.1 * jax.random.normal(ks[5], (H, 4 * nf), jnp.float32)
    beta = 0.1 * jax.random.normal(ks[6], (H, 4 * nf), jnp.float32)
    rmean = 0.1 * jax.random.normal(ks[7], (H, 4 * nf), jnp.float32)
    rvar = 1.0 + 0.1 * jax.random.uniform(ks[8], (H, 4 * nf), jnp.float32)
    scale = gamma / jnp.sqrt(rvar + BN_EPS)
    shift = beta - rmean * scale
    return _pack_inception(wb, wc, wmp, scale, shift, c_in=c_in, nf=nf, H=H)


def init_params(key, c_in, c_out, d_model, num_heads):
    assert c_out % (num_heads * 4) == 0
    nf = c_out // num_heads // 4
    kq, kk, kv, kf, kb = jax.random.split(key, 5)
    # Conv1dSame(c_out -> d_model, ks=3, bias=True): (3, c_out, d_model) [k, ci, co]
    wf = jax.random.normal(kf, (3, c_out, d_model), jnp.float32) / jnp.sqrt(3.0 * c_out)
    bf = 0.1 * jax.random.normal(kb, (d_model,), jnp.float32)
    return dict(
        wq=_init_inception(kq, c_in, nf, num_heads),
        wk=_init_inception(kk, c_in, nf, num_heads),
        wv=_init_inception(kv, c_in, nf, num_heads),
        wf=wf.astype(jnp.bfloat16), bf=bf,
    )


if __name__ == "__main__":
    B, c_in, L = 2, 4, 16
    c_out, d_model, num_heads = 64, 64, 4        # nf = c_out / H / 4 = 4
    key = jax.random.PRNGKey(0)
    kx, kp = jax.random.split(key)
    x = jax.random.normal(kx, (B, c_in, L), jnp.float32)   # NCL, like torch Conv1d
    params = init_params(kp, c_in, c_out, d_model, num_heads)

    fwd = jax.jit(functools.partial(inception_self_atten, num_heads=num_heads))
    out, attn_w = fwd(x, x, x, params)
    jax.block_until_ready((out, attn_w))

    assert out.shape == (B, d_model, L)
    assert attn_w.shape == (num_heads * B, L, L)
    assert bool(jnp.all(jnp.isfinite(out))) and bool(jnp.all(jnp.isfinite(attn_w)))
    print("KERNEL_OK")
</pallas_src>

<mosaic_0001>
module attributes {stable_mosaic.version = 11 : i64} {
  func.func @_inception_kernel(%arg0: i32, %arg1: memref<1x54x4xf32, #tpu.memory_space<vmem>>, %arg2: memref<4x16xbf16, #tpu.memory_space<vmem>>, %arg3: memref<4x16xbf16, #tpu.memory_space<vmem>>, %arg4: memref<39x16x48xbf16, #tpu.memory_space<vmem>>, %arg5: memref<1x48xf32, #tpu.memory_space<vmem>>, %arg6: memref<1x48xf32, #tpu.memory_space<vmem>>, %arg7: memref<1x16xf32, #tpu.memory_space<vmem>>, %arg8: memref<1x16xf32, #tpu.memory_space<vmem>>, %arg9: memref<1x16x48xbf16, #tpu.memory_space<vmem>>, %arg10: memref<1x16x16xbf16, #tpu.memory_space<vmem>>) attributes {dimension_semantics = [#tpu.dimension_semantics<parallel>], iteration_bounds = array<i64: 2>, scalar_prefetch = 0 : i64, scratch_operands = 0 : i64, tpu.core_type = #tpu.core_type<tc>, window_params = [{transform_indices = @transform_0, window_bounds = array<i64: 1, 54, 4>}, {pipeline_mode = #tpu.pipeline_mode<synchronous>, transform_indices = @transform_1, window_bounds = array<i64: 4, 16>}, {pipeline_mode = #tpu.pipeline_mode<synchronous>, transform_indices = @transform_2, window_bounds = array<i64: 4, 16>}, {pipeline_mode = #tpu.pipeline_mode<synchronous>, transform_indices = @transform_3, window_bounds = array<i64: 39, 16, 48>}, {pipeline_mode = #tpu.pipeline_mode<synchronous>, transform_indices = @transform_4, window_bounds = array<i64: 1, 48>}, {pipeline_mode = #tpu.pipeline_mode<synchronous>, transform_indices = @transform_5, window_bounds = array<i64: 1, 48>}, {pipeline_mode = #tpu.pipeline_mode<synchronous>, transform_indices = @transform_6, window_bounds = array<i64: 1, 16>}, {pipeline_mode = #tpu.pipeline_mode<synchronous>, transform_indices = @transform_7, window_bounds = array<i64: 1, 16>}, {transform_indices = @transform_8, window_bounds = array<i64: 1, 16, 48>}, {transform_indices = @transform_9, window_bounds = array<i64: 1, 16, 16>}]} {
    %c0 = arith.constant 0 : index
    %c0_0 = arith.constant 0 : index
    %c0_1 = arith.constant 0 : index
    %0 = vector.load %arg1[%c0, %c0_0, %c0_1] : memref<1x54x4xf32, #tpu.memory_space<vmem>>, vector<1x54x4xf32>
    %1 = vector.shape_cast %0 : vector<1x54x4xf32> to vector<54x4xf32>
    %2 = arith.truncf %1 : vector<54x4xf32> to vector<54x4xbf16>
    %c0_2 = arith.constant 0 : index
    %c0_3 = arith.constant 0 : index
    %3 = vector.load %arg2[%c0_2, %c0_3] : memref<4x16xbf16, #tpu.memory_space<vmem>>, vector<4x16xbf16>
    %cst = arith.constant dense<0.000000e+00> : vector<54x16xf32>
    %4 = tpu.matmul %2, %3, %cst {dimension_numbers = #tpu.dot_dimension_numbers<[1], [0], [0], [1], [0, 0, 1, 1], [], []>} : vector<54x4xbf16>, vector<4x16xbf16>, vector<54x16xf32> -> vector<54x16xf32>
    %5 = arith.truncf %4 : vector<54x16xf32> to vector<54x16xbf16>
    %cst_4 = arith.constant 0.000000e+00 : f32
    %6 = vector.broadcast %cst_4 : f32 to vector<16x48xf32>
    %7 = vector.extract_strided_slice %5 {offsets = [0, 0], sizes = [16, 16], strides = [1, 1]} : vector<54x16xbf16> to vector<16x16xbf16>
    %c0_5 = arith.constant 0 : index
    %c0_6 = arith.constant 0 : index
    %c0_7 = arith.constant 0 : index
    %8 = vector.load %arg4[%c0_5, %c0_6, %c0_7] : memref<39x16x48xbf16, #tpu.memory_space<vmem>>, vector<1x16x48xbf16>
    %9 = vector.shape_cast %8 : vector<1x16x48xbf16> to vector<16x48xbf16>
    %cst_8 = arith.constant dense<0.000000e+00> : vector<16x48xf32>
    %10 = tpu.matmul %7, %9, %cst_8 {dimension_numbers = #tpu.dot_dimension_numbers<[1], [0], [0], [1], [0, 0, 1, 1], [], []>} : vector<16x16xbf16>, vector<16x48xbf16>, vector<16x48xf32> -> vector<16x48xf32>
    %11 = arith.addf %6, %10 : vector<16x48xf32>
    %12 = vector.extract_strided_slice %5 {offsets = [1, 0], sizes = [16, 16], strides = [1, 1]} : vector<54x16xbf16> to vector<16x16xbf16>
    %c1 = arith.constant 1 : index
    %c0_9 = arith.constant 0 : index
    %c0_10 = arith.constant 0 : index
    %13 = vector.load %arg4[%c1, %c0_9, %c0_10] : memref<39x16x48xbf16, #tpu.memory_space<vmem>>, vector<1x16x48xbf16>
    %14 = vector.shape_cast %13 : vector<1x16x48xbf16> to vector<16x48xbf16>
    %cst_11 = arith.constant dense<0.000000e+00> : vector<16x48xf32>
    %15 = tpu.matmul %12, %14, %cst_11 {dimension_numbers = #tpu.dot_dimension_numbers<[1], [0], [0], [1], [0, 0, 1, 1], [], []>} : vector<16x16xbf16>, vector<16x48xbf16>, vector<16x48xf32> -> vector<16x48xf32>
    %16 = arith.addf %11, %15 : vector<16x48xf32>
    %17 = vector.extract_strided_slice %5 {offsets = [2, 0], sizes = [16, 16], strides = [1, 1]} : vector<54x16xbf16> to vector<16x16xbf16>
    %c2 = arith.constant 2 : index
    %c0_12 = arith.constant 0 : index
    %c0_13 = arith.constant 0 : index
    %18 = vector.load %arg4[%c2, %c0_12, %c0_13] : memref<39x16x48xbf16, #tpu.memory_space<vmem>>, vector<1x16x48xbf16>
    %19 = vector.shape_cast %18 : vector<1x16x48xbf16> to vector<16x48xbf16>
    %cst_14 = arith.constant dense<0.000000e+00> : vector<16x48xf32>
    %20 = tpu.matmul %17, %19, %cst_14 {dimension_numbers = #tpu.dot_dimension_numbers<[1], [0], [0], [1], [0, 0, 1, 1], [], []>} : vector<16x16xbf16>, vector<16x48xbf16>, vector<16x48xf32> -> vector<16x48xf32>
    %21 = arith.addf %16, %20 : vector<16x48xf32>
    %22 = vector.extract_strided_slice %5 {offsets = [3, 0], sizes = [16, 16], strides = [1, 1]} : vector<54x16xbf16> to vector<16x16xbf16>
    %c3 = arith.constant 3 : index
    %c0_15 = arith.constant 0 : index
    %c0_16 = arith.constant 0 : index
    %23 = vector.load %arg4[%c3, %c0_15, %c0_16] : memref<39x16x48xbf16, #tpu.memory_space<vmem>>, vector<1x16x48xbf16>
    %24 = vector.shape_cast %23 : vector<1x16x48xbf16> to vector<16x48xbf16>
    %cst_17 = arith.constant dense<0.000000e+00> : vector<16x48xf32>
    %25 = tpu.matmul %22, %24, %cst_17 {dimension_numbers = #tpu.dot_dimension_numbers<[1], [0], [0], [1], [0, 0, 1, 1], [], []>} : vector<16x16xbf16>, vector<16x48xbf16>, vector<16x48xf32> -> vector<16x48xf32>
    %26 = arith.addf %21, %25 : vector<16x48xf32>
    %27 = vector.extract_strided_slice %5 {offsets = [4, 0], sizes = [16, 16], strides = [1, 1]} : vector<54x16xbf16> to vector<16x16xbf16>
    %c4 = arith.constant 4 : index
    %c0_18 = arith.constant 0 : index
    %c0_19 = arith.constant 0 : index
    %28 = vector.load %arg4[%c4, %c0_18, %c0_19] : memref<39x16x48xbf16, #tpu.memory_space<vmem>>, vector<1x16x48xbf16>
    %29 = vector.shape_cast %28 : vector<1x16x48xbf16> to vector<16x48xbf16>
    %cst_20 = arith.constant dense<0.000000e+00> : vector<16x48xf32>
    %30 = tpu.matmul %27, %29, %cst_20 {dimension_numbers = #tpu.dot_dimension_numbers<[1], [0], [0], [1], [0, 0, 1, 1], [], []>} : vector<16x16xbf16>, vector<16x48xbf16>, vector<16x48xf32> -> vector<16x48xf32>
    %31 = arith.addf %26, %30 : vector<16x48xf32>
    %32 = vector.extract_strided_slice %5 {offsets = [5, 0], sizes = [16, 16], strides = [1, 1]} : vector<54x16xbf16> to vector<16x16xbf16>
    %c5 = arith.constant 5 : index
    %c0_21 = arith.constant 0 : index
    %c0_22 = arith.constant 0 : index
    %33 = vector.load %arg4[%c5, %c0_21, %c0_22] : memref<39x16x48xbf16, #tpu.memory_space<vmem>>, vector<1x16x48xbf16>
    %34 = vector.shape_cast %33 : vector<1x16x48xbf16> to vector<16x48xbf16>
    %cst_23 = arith.constant dense<0.000000e+00> : vector<16x48xf32>
    %35 = tpu.matmul %32, %34, %cst_23 {dimension_numbers = #tpu.dot_dimension_numbers<[1], [0], [0], [1], [0, 0, 1, 1], [], []>} : vector<16x16xbf16>, vector<16x48xbf16>, vector<16x48xf32> -> vector<16x48xf32>
    %36 = arith.addf %31, %35 : vector<16x48xf32>
    %37 = vector.extract_strided_slice %5 {offsets = [6, 0], sizes = [16, 16], strides = [1, 1]} : vector<54x16xbf16> to vector<16x16xbf16>
    %c6 = arith.constant 6 : index
    %c0_24 = arith.constant 0 : index
    %c0_25 = arith.constant 0 : index
    %38 = vector.load %arg4[%c6, %c0_24, %c0_25] : memref<39x16x48xbf16, #tpu.memory_space<vmem>>, vector<1x16x48xbf16>
    %39 = vector.shape_cast %38 : vector<1x16x48xbf16> to vector<16x48xbf16>
    %cst_26 = arith.constant dense<0.000000e+00> : vector<16x48xf32>
    %40 = tpu.matmul %37, %39, %cst_26 {dimension_numbers = #tpu.dot_dimension_numbers<[1], [0], [0], [1], [0, 0, 1, 1], [], []>} : vector<16x16xbf16>, vector<16x48xbf16>, vector<16x48xf32> -> vector<16x48xf32>
    %41 = arith.addf %36, %40 : vector<16x48xf32>
    %42 = vector.extract_strided_slice %5 {offsets = [7, 0], sizes = [16, 16], strides = [1, 1]} : vector<54x16xbf16> to vector<16x16xbf16>
    %c7 = arith.constant 7 : index
    %c0_27 = arith.constant 0 : index
    %c0_28 = arith.constant 0 : index
    %43 = vector.load %arg4[%c7, %c0_27, %c0_28] : memref<39x16x48xbf16, #tpu.memory_space<vmem>>, vector<1x16x48xbf16>
    %44 = vector.shape_cast %43 : vector<1x16x48xbf16> to vector<16x48xbf16>
    %cst_29 = arith.constant dense<0.000000e+00> : vector<16x48xf32>
    %45 = tpu.matmul %42, %44, %cst_29 {dimension_numbers = #tpu.dot_dimension_numbers<[1], [0], [0], [1], [0, 0, 1, 1], [], []>} : vector<16x16xbf16>, vector<16x48xbf16>, vector<16x48xf32> -> vector<16x48xf32>
    %46 = arith.addf %41, %45 : vector<16x48xf32>
    %47 = vector.extract_strided_slice %5 {offsets = [8, 0], sizes = [16, 16], strides = [1, 1]} : vector<54x16xbf16> to vector<16x16xbf16>
    %c8 = arith.constant 8 : index
    %c0_30 = arith.constant 0 : index
    %c0_31 = arith.constant 0 : index
    %48 = vector.load %arg4[%c8, %c0_30, %c0_31] : memref<39x16x48xbf16, #tpu.memory_space<vmem>>, vector<1x16x48xbf16>
    %49 = vector.shape_cast %48 : vector<1x16x48xbf16> to vector<16x48xbf16>
    %cst_32 = arith.constant dense<0.000000e+00> : vector<16x48xf32>
    %50 = tpu.matmul %47, %49, %cst_32 {dimension_numbers = #tpu.dot_dimension_numbers<[1], [0], [0], [1], [0, 0, 1, 1], [], []>} : vector<16x16xbf16>, vector<16x48xbf16>, vector<16x48xf32> -> vector<16x48xf32>
    %51 = arith.addf %46, %50 : vector<16x48xf32>
    %52 = vector.extract_strided_slice %5 {offsets = [9, 0], sizes = [16, 16], strides = [1, 1]} : vector<54x16xbf16> to vector<16x16xbf16>
    %c9 = arith.constant 9 : index
    %c0_33 = arith.constant 0 : index
    %c0_34 = arith.constant 0 : index
    %53 = vector.load %arg4[%c9, %c0_33, %c0_34] : memref<39x16x48xbf16, #tpu.memory_space<vmem>>, vector<1x16x48xbf16>
    %54 = vector.shape_cast %53 : vector<1x16x48xbf16> to vector<16x48xbf16>
    %cst_35 = arith.constant dense<0.000000e+00> : vector<16x48xf32>
    %55 = tpu.matmul %52, %54, %cst_35 {dimension_numbers = #tpu.dot_dimension_numbers<[1], [0], [0], [1], [0, 0, 1, 1], [], []>} : vector<16x16xbf16>, vector<16x48xbf16>, vector<16x48xf32> -> vector<16x48xf32>
    %56 = arith.addf %51, %55 : vector<16x48xf32>
    %57 = vector.extract_strided_slice %5 {offsets = [10, 0], sizes = [16, 16], strides = [1, 1]} : vector<54x16xbf16> to vector<16x16xbf16>
    %c10 = arith.constant 10 : index
    %c0_36 = arith.constant 0 : index
    %c0_37 = arith.constant 0 : index
    %58 = vector.load %arg4[%c10, %c0_36, %c0_37] : memref<39x16x48xbf16, #tpu.memory_space<vmem>>, vector<1x16x48xbf16>
    %59 = vector.shape_cast %58 : vector<1x16x48xbf16> to vector<16x48xbf16>
    %cst_38 = arith.constant dense<0.000000e+00> : vector<16x48xf32>
    %60 = tpu.matmul %57, %59, %cst_38 {dimension_numbers = #tpu.dot_dimension_numbers<[1], [0], [0], [1], [0, 0, 1, 1], [], []>} : vector<16x16xbf16>, vector<16x48xbf16>, vector<16x48xf32> -> vector<16x48xf32>
    %61 = arith.addf %56, %60 : vector<16x48xf32>
    %62 = vector.extract_strided_slice %5 {offsets = [11, 0], sizes = [16, 16], strides = [1, 1]} : vector<54x16xbf16> to vector<16x16xbf16>
    %c11 = arith.constant 11 : index
    %c0_39 = arith.constant 0 : index
    %c0_40 = arith.constant 0 : index
    %63 = vector.load %arg4[%c11, %c0_39, %c0_40] : memref<39x16x48xbf16, #tpu.memory_space<vmem>>, vector<1x16x48xbf16>
    %64 = vector.shape_cast %63 : vector<1x16x48xbf16> to vector<16x48xbf16>
    %cst_41 = arith.constant dense<0.000000e+00> : vector<16x48xf32>
    %65 = tpu.matmul %62, %64, %cst_41 {dimension_numbers = #tpu.dot_dimension_numbers<[1], [0], [0], [1], [0, 0, 1, 1], [], []>} : vector<16x16xbf16>, vector<16x48xbf16>, vector<16x48xf32> -> vector<16x48xf32>
    %66 = arith.addf %61, %65 : vector<16x48xf32>
    %67 = vector.extract_strided_slice %5 {offsets = [12, 0], sizes = [16, 16], strides = [1, 1]} : vector<54x16xbf16> to vector<16x16xbf16>
    %c12 = arith.constant 12 : index
    %c0_42 = arith.constant 0 : index
    %c0_43 = arith.constant 0 : index
    %68 = vector.load %arg4[%c12, %c0_42, %c0_43] : memref<39x16x48xbf16, #tpu.memory_space<vmem>>, vector<1x16x48xbf16>
    %69 = vector.shape_cast %68 : vector<1x16x48xbf16> to vector<16x48xbf16>
    %cst_44 = arith.constant dense<0.000000e+00> : vector<16x48xf32>
    %70 = tpu.matmul %67, %69, %cst_44 {dimension_numbers = #tpu.dot_dimension_numbers<[1], [0], [0], [1], [0, 0, 1, 1], [], []>} : vector<16x16xbf16>, vector<16x48xbf16>, vector<16x48xf32> -> vector<16x48xf32>
    %71 = arith.addf %66, %70 : vector<16x48xf32>
    %72 = vector.extract_strided_slice %5 {offsets = [13, 0], sizes = [16, 16], strides = [1, 1]} : vector<54x16xbf16> to vector<16x16xbf16>
    %c13 = arith.constant 13 : index
    %c0_45 = arith.constant 0 : index
    %c0_46 = arith.constant 0 : index
    %73 = vector.load %arg4[%c13, %c0_45, %c0_46] : memref<39x16x48xbf16, #tpu.memory_space<vmem>>, vector<1x16x48xbf16>
    %74 = vector.shape_cast %73 : vector<1x16x48xbf16> to vector<16x48xbf16>
    %cst_47 = arith.constant dense<0.000000e+00> : vector<16x48xf32>
    %75 = tpu.matmul %72, %74, %cst_47 {dimension_numbers = #tpu.dot_dimension_numbers<[1], [0], [0], [1], [0, 0, 1, 1], [], []>} : vector<16x16xbf16>, vector<16x48xbf16>, vector<16x48xf32> -> vector<16x48xf32>
    %76 = arith.addf %71, %75 : vector<16x48xf32>
    %77 = vector.extract_strided_slice %5 {offsets = [14, 0], sizes = [16, 16], strides = [1, 1]} : vector<54x16xbf16> to vector<16x16xbf16>
    %c14 = arith.constant 14 : index
    %c0_48 = arith.constant 0 : index
    %c0_49 = arith.constant 0 : index
    %78 = vector.load %arg4[%c14, %c0_48, %c0_49] : memref<39x16x48xbf16, #tpu.memory_space<vmem>>, vector<1x16x48xbf16>
    %79 = vector.shape_cast %78 : vector<1x16x48xbf16> to vector<16x48xbf16>
    %cst_50 = arith.constant dense<0.000000e+00> : vector<16x48xf32>
    %80 = tpu.matmul %77, %79, %cst_50 {dimension_numbers = #tpu.dot_dimension_numbers<[1], [0], [0], [1], [0, 0, 1, 1], [], []>} : vector<16x16xbf16>, vector<16x48xbf16>, vector<16x48xf32> -> vector<16x48xf32>
    %81 = arith.addf %76, %80 : vector<16x48xf32>
    %82 = vector.extract_strided_slice %5 {offsets = [15, 0], sizes = [16, 16], strides = [1, 1]} : vector<54x16xbf16> to vector<16x16xbf16>
    %c15 = arith.constant 15 : index
    %c0_51 = arith.constant 0 : index
    %c0_52 = arith.constant 0 : index
    %83 = vector.load %arg4[%c15, %c0_51, %c0_52] : memref<39x16x48xbf16, #tpu.memory_space<vmem>>, vector<1x16x48xbf16>
    %84 = vector.shape_cast %83 : vector<1x16x48xbf16> to vector<16x48xbf16>
    %cst_53 = arith.constant dense<0.000000e+00> : vector<16x48xf32>
    %85 = tpu.matmul %82, %84, %cst_53 {dimension_numbers = #tpu.dot_dimension_numbers<[1], [0], [0], [1], [0, 0, 1, 1], [], []>} : vector<16x16xbf16>, vector<16x48xbf16>, vector<16x48xf32> -> vector<16x48xf32>
    %86 = arith.addf %81, %85 : vector<16x48xf32>
    %87 = vector.extract_strided_slice %5 {offsets = [16, 0], sizes = [16, 16], strides = [1, 1]} : vector<54x16xbf16> to vector<16x16xbf16>
    %c16 = arith.constant 16 : index
    %c0_54 = arith.constant 0 : index
    %c0_55 = arith.constant 0 : index
    %88 = vector.load %arg4[%c16, %c0_54, %c0_55] : memref<39x16x48xbf16, #tpu.memory_space<vmem>>, vector<1x16x48xbf16>
    %89 = vector.shape_cast %88 : vector<1x16x48xbf16> to vector<16x48xbf16>
    %cst_56 = arith.constant dense<0.000000e+00> : vector<16x48xf32>
    %90 = tpu.matmul %87, %89, %cst_56 {dimension_numbers = #tpu.dot_dimension_numbers<[1], [0], [0], [1], [0, 0, 1, 1], [], []>} : vector<16x16xbf16>, vector<16x48xbf16>, vector<16x48xf32> -> vector<16x48xf32>
    %91 = arith.addf %86, %90 : vector<16x48xf32>
    %92 = vector.extract_strided_slice %5 {offsets = [17, 0], sizes = [16, 16], strides = [1, 1]} : vector<54x16xbf16> to vector<16x16xbf16>
    %c17 = arith.constant 17 : index
    %c0_57 = arith.constant 0 : index
    %c0_58 = arith.constant 0 : index
    %93 = vector.load %arg4[%c17, %c0_57, %c0_58] : memref<39x16x48xbf16, #tpu.memory_space<vmem>>, vector<1x16x48xbf16>
    %94 = vector.shape_cast %93 : vector<1x16x48xbf16> to vector<16x48xbf16>
    %cst_59 = arith.constant dense<0.000000e+00> : vector<16x48xf32>
    %95 = tpu.matmul %92, %94, %cst_59 {dimension_numbers = #tpu.dot_dimension_numbers<[1], [0], [0], [1], [0, 0, 1, 1], [], []>} : vector<16x16xbf16>, vector<16x48xbf16>, vector<16x48xf32> -> vector<16x48xf32>
    %96 = arith.addf %91, %95 : vector<16x48xf32>
    %97 = vector.extract_strided_slice %5 {offsets = [18, 0], sizes = [16, 16], strides = [1, 1]} : vector<54x16xbf16> to vector<16x16xbf16>
    %c18 = arith.constant 18 : index
    %c0_60 = arith.constant 0 : index
    %c0_61 = arith.constant 0 : index
    %98 = vector.load %arg4[%c18, %c0_60, %c0_61] : memref<39x16x48xbf16, #tpu.memory_space<vmem>>, vector<1x16x48xbf16>
    %99 = vector.shape_cast %98 : vector<1x16x48xbf16> to vector<16x48xbf16>
    %cst_62 = arith.constant dense<0.000000e+00> : vector<16x48xf32>
    %100 = tpu.matmul %97, %99, %cst_62 {dimension_numbers = #tpu.dot_dimension_numbers<[1], [0], [0], [1], [0, 0, 1, 1], [], []>} : vector<16x16xbf16>, vector<16x48xbf16>, vector<16x48xf32> -> vector<16x48xf32>
    %101 = arith.addf %96, %100 : vector<16x48xf32>
    %102 = vector.extract_strided_slice %5 {offsets = [19, 0], sizes = [16, 16], strides = [1, 1]} : vector<54x16xbf16> to vector<16x16xbf16>
    %c19 = arith.constant 19 : index
    %c0_63 = arith.constant 0 : index
    %c0_64 = arith.constant 0 : index
    %103 = vector.load %arg4[%c19, %c0_63, %c0_64] : memref<39x16x48xbf16, #tpu.memory_space<vmem>>, vector<1x16x48xbf16>
    %104 = vector.shape_cast %103 : vector<1x16x48xbf16> to vector<16x48xbf16>
    %cst_65 = arith.constant dense<0.000000e+00> : vector<16x48xf32>
    %105 = tpu.matmul %102, %104, %cst_65 {dimension_numbers = #tpu.dot_dimension_numbers<[1], [0], [0], [1], [0, 0, 1, 1], [], []>} : vector<16x16xbf16>, vector<16x48xbf16>, vector<16x48xf32> -> vector<16x48xf32>
    %106 = arith.addf %101, %105 : vector<16x48xf32>
    %107 = vector.extract_strided_slice %5 {offsets = [20, 0], sizes = [16, 16], strides = [1, 1]} : vector<54x16xbf16> to vector<16x16xbf16>
    %c20 = arith.constant 20 : index
    %c0_66 = arith.constant 0 : index
    %c0_67 = arith.constant 0 : index
    %108 = vector.load %arg4[%c20, %c0_66, %c0_67] : memref<39x16x48xbf16, #tpu.memory_space<vmem>>, vector<1x16x48xbf16>
    %109 = vector.shape_cast %108 : vector<1x16x48xbf16> to vector<16x48xbf16>
    %cst_68 = arith.constant dense<0.000000e+00> : vector<16x48xf32>
    %110 = tpu.matmul %107, %109, %cst_68 {dimension_numbers = #tpu.dot_dimension_numbers<[1], [0], [0], [1], [0, 0, 1, 1], [], []>} : vector<16x16xbf16>, vector<16x48xbf16>, vector<16x48xf32> -> vector<16x48xf32>
    %111 = arith.addf %106, %110 : vector<16x48xf32>
    %112 = vector.extract_strided_slice %5 {offsets = [21, 0], sizes = [16, 16], strides = [1, 1]} : vector<54x16xbf16> to vector<16x16xbf16>
    %c21 = arith.constant 21 : index
    %c0_69 = arith.constant 0 : index
    %c0_70 = arith.constant 0 : index
    %113 = vector.load %arg4[%c21, %c0_69, %c0_70] : memref<39x16x48xbf16, #tpu.memory_space<vmem>>, vector<1x16x48xbf16>
    %114 = vector.shape_cast %113 : vector<1x16x48xbf16> to vector<16x48xbf16>
    %cst_71 = arith.constant dense<0.000000e+00> : vector<16x48xf32>
    %115 = tpu.matmul %112, %114, %cst_71 {dimension_numbers = #tpu.dot_dimension_numbers<[1], [0], [0], [1], [0, 0, 1, 1], [], []>} : vector<16x16xbf16>, vector<16x48xbf16>, vector<16x48xf32> -> vector<16x48xf32>
    %116 = arith.addf %111, %115 : vector<16x48xf32>
    %117 = vector.extract_strided_slice %5 {offsets = [22, 0], sizes = [16, 16], strides = [1, 1]} : vector<54x16xbf16> to vector<16x16xbf16>
    %c22 = arith.constant 22 : index
    %c0_72 = arith.constant 0 : index
    %c0_73 = arith.constant 0 : index
    %118 = vector.load %arg4[%c22, %c0_72, %c0_73] : memref<39x16x48xbf16, #tpu.memory_space<vmem>>, vector<1x16x48xbf16>
    %119 = vector.shape_cast %118 : vector<1x16x48xbf16> to vector<16x48xbf16>
    %cst_74 = arith.constant dense<0.000000e+00> : vector<16x48xf32>
    %120 = tpu.matmul %117, %119, %cst_74 {dimension_numbers = #tpu.dot_dimension_numbers<[1], [0], [0], [1], [0, 0, 1, 1], [], []>} : vector<16x16xbf16>, vector<16x48xbf16>, vector<16x48xf32> -> vector<16x48xf32>
    %121 = arith.addf %116, %120 : vector<16x48xf32>
    %122 = vector.extract_strided_slice %5 {offsets = [23, 0], sizes = [16, 16], strides = [1, 1]} : vector<54x16xbf16> to vector<16x16xbf16>
    %c23 = arith.constant 23 : index
    %c0_75 = arith.constant 0 : index
    %c0_76 = arith.constant 0 : index
    %123 = vector.load %arg4[%c23, %c0_75, %c0_76] : memref<39x16x48xbf16, #tpu.memory_space<vmem>>, vector<1x16x48xbf16>
    %124 = vector.shape_cast %123 : vector<1x16x48xbf16> to vector<16x48xbf16>
    %cst_77 = arith.constant dense<0.000000e+00> : vector<16x48xf32>
    %125 = tpu.matmul %122, %124, %cst_77 {dimension_numbers = #tpu.dot_dimension_numbers<[1], [0], [0], [1], [0, 0, 1, 1], [], []>} : vector<16x16xbf16>, vector<16x48xbf16>, vector<16x48xf32> -> vector<16x48xf32>
    %126 = arith.addf %121, %125 : vector<16x48xf32>
    %127 = vector.extract_strided_slice %5 {offsets = [24, 0], sizes = [16, 16], strides = [1, 1]} : vector<54x16xbf16> to vector<16x16xbf16>
    %c24 = arith.constant 24 : index
    %c0_78 = arith.constant 0 : index
    %c0_79 = arith.constant 0 : index
    %128 = vector.load %arg4[%c24, %c0_78, %c0_79] : memref<39x16x48xbf16, #tpu.memory_space<vmem>>, vector<1x16x48xbf16>
    %129 = vector.shape_cast %128 : vector<1x16x48xbf16> to vector<16x48xbf16>
    %cst_80 = arith.constant dense<0.000000e+00> : vector<16x48xf32>
    %130 = tpu.matmul %127, %129, %cst_80 {dimension_numbers = #tpu.dot_dimension_numbers<[1], [0], [0], [1], [0, 0, 1, 1], [], []>} : vector<16x16xbf16>, vector<16x48xbf16>, vector<16x48xf32> -> vector<16x48xf32>
    %131 = arith.addf %126, %130 : vector<16x48xf32>
    %132 = vector.extract_strided_slice %5 {offsets = [25, 0], sizes = [16, 16], strides = [1, 1]} : vector<54x16xbf16> to vector<16x16xbf16>
    %c25 = arith.constant 25 : index
    %c0_81 = arith.constant 0 : index
    %c0_82 = arith.constant 0 : index
    %133 = vector.load %arg4[%c25, %c0_81, %c0_82] : memref<39x16x48xbf16, #tpu.memory_space<vmem>>, vector<1x16x48xbf16>
    %134 = vector.shape_cast %133 : vector<1x16x48xbf16> to vector<16x48xbf16>
    %cst_83 = arith.constant dense<0.000000e+00> : vector<16x48xf32>
    %135 = tpu.matmul %132, %134, %cst_83 {dimension_numbers = #tpu.dot_dimension_numbers<[1], [0], [0], [1], [0, 0, 1, 1], [], []>} : vector<16x16xbf16>, vector<16x48xbf16>, vector<16x48xf32> -> vector<16x48xf32>
    %136 = arith.addf %131, %135 : vector<16x48xf32>
    %137 = vector.extract_strided_slice %5 {offsets = [26, 0], sizes = [16, 16], strides = [1, 1]} : vector<54x16xbf16> to vector<16x16xbf16>
    %c26 = arith.constant 26 : index
    %c0_84 = arith.constant 0 : index
    %c0_85 = arith.constant 0 : index
    %138 = vector.load %arg4[%c26, %c0_84, %c0_85] : memref<39x16x48xbf16, #tpu.memory_space<vmem>>, vector<1x16x48xbf16>
    %139 = vector.shape_cast %138 : vector<1x16x48xbf16> to vector<16x48xbf16>
    %cst_86 = arith.constant dense<0.000000e+00> : vector<16x48xf32>
    %140 = tpu.matmul %137, %139, %cst_86 {dimension_numbers = #tpu.dot_dimension_numbers<[1], [0], [0], [1], [0, 0, 1, 1], [], []>} : vector<16x16xbf16>, vector<16x48xbf16>, vector<16x48xf32> -> vector<16x48xf32>
    %141 = arith.addf %136, %140 : vector<16x48xf32>
    %142 = vector.extract_strided_slice %5 {offsets = [27, 0], sizes = [16, 16], strides = [1, 1]} : vector<54x16xbf16> to vector<16x16xbf16>
    %c27 = arith.constant 27 : index
    %c0_87 = arith.constant 0 : index
    %c0_88 = arith.constant 0 : index
    %143 = vector.load %arg4[%c27, %c0_87, %c0_88] : memref<39x16x48xbf16, #tpu.memory_space<vmem>>, vector<1x16x48xbf16>
    %144 = vector.shape_cast %143 : vector<1x16x48xbf16> to vector<16x48xbf16>
    %cst_89 = arith.constant dense<0.000000e+00> : vector<16x48xf32>
    %145 = tpu.matmul %142, %144, %cst_89 {dimension_numbers = #tpu.dot_dimension_numbers<[1], [0], [0], [1], [0, 0, 1, 1], [], []>} : vector<16x16xbf16>, vector<16x48xbf16>, vector<16x48xf32> -> vector<16x48xf32>
    %146 = arith.addf %141, %145 : vector<16x48xf32>
    %147 = vector.extract_strided_slice %5 {offsets = [28, 0], sizes = [16, 16], strides = [1, 1]} : vector<54x16xbf16> to vector<16x16xbf16>
    %c28 = arith.constant 28 : index
    %c0_90 = arith.constant 0 : index
    %c0_91 = arith.constant 0 : index
    %148 = vector.load %arg4[%c28, %c0_90, %c0_91] : memref<39x16x48xbf16, #tpu.memory_space<vmem>>, vector<1x16x48xbf16>
    %149 = vector.shape_cast %148 : vector<1x16x48xbf16> to vector<16x48xbf16>
    %cst_92 = arith.constant dense<0.000000e+00> : vector<16x48xf32>
    %150 = tpu.matmul %147, %149, %cst_92 {dimension_numbers = #tpu.dot_dimension_numbers<[1], [0], [0], [1], [0, 0, 1, 1], [], []>} : vector<16x16xbf16>, vector<16x48xbf16>, vector<16x48xf32> -> vector<16x48xf32>
    %151 = arith.addf %146, %150 : vector<16x48xf32>
    %152 = vector.extract_strided_slice %5 {offsets = [29, 0], sizes = [16, 16], strides = [1, 1]} : vector<54x16xbf16> to vector<16x16xbf16>
    %c29 = arith.constant 29 : index
    %c0_93 = arith.constant 0 : index
    %c0_94 = arith.constant 0 : index
    %153 = vector.load %arg4[%c29, %c0_93, %c0_94] : memref<39x16x48xbf16, #tpu.memory_space<vmem>>, vector<1x16x48xbf16>
    %154 = vector.shape_cast %153 : vector<1x16x48xbf16> to vector<16x48xbf16>
    %cst_95 = arith.constant dense<0.000000e+00> : vector<16x48xf32>
    %155 = tpu.matmul %152, %154, %cst_95 {dimension_numbers = #tpu.dot_dimension_numbers<[1], [0], [0], [1], [0, 0, 1, 1], [], []>} : vector<16x16xbf16>, vector<16x48xbf16>, vector<16x48xf32> -> vector<16x48xf32>
    %156 = arith.addf %151, %155 : vector<16x48xf32>
    %157 = vector.extract_strided_slice %5 {offsets = [30, 0], sizes = [16, 16], strides = [1, 1]} : vector<54x16xbf16> to vector<16x16xbf16>
    %c30 = arith.constant 30 : index
    %c0_96 = arith.constant 0 : index
    %c0_97 = arith.constant 0 : index
    %158 = vector.load %arg4[%c30, %c0_96, %c0_97] : memref<39x16x48xbf16, #tpu.memory_space<vmem>>, vector<1x16x48xbf16>
    %159 = vector.shape_cast %158 : vector<1x16x48xbf16> to vector<16x48xbf16>
    %cst_98 = arith.constant dense<0.000000e+00> : vector<16x48xf32>
    %160 = tpu.matmul %157, %159, %cst_98 {dimension_numbers = #tpu.dot_dimension_numbers<[1], [0], [0], [1], [0, 0, 1, 1], [], []>} : vector<16x16xbf16>, vector<16x48xbf16>, vector<16x48xf32> -> vector<16x48xf32>
    %161 = arith.addf %156, %160 : vector<16x48xf32>
    %162 = vector.extract_strided_slice %5 {offsets = [31, 0], sizes = [16, 16], strides = [1, 1]} : vector<54x16xbf16> to vector<16x16xbf16>
    %c31 = arith.constant 31 : index
    %c0_99 = arith.constant 0 : index
    %c0_100 = arith.constant 0 : index
    %163 = vector.load %arg4[%c31, %c0_99, %c0_100] : memref<39x16x48xbf16, #tpu.memory_space<vmem>>, vector<1x16x48xbf16>
    %164 = vector.shape_cast %163 : vector<1x16x48xbf16> to vector<16x48xbf16>
    %cst_101 = arith.constant dense<0.000000e+00> : vector<16x48xf32>
    %165 = tpu.matmul %162, %164, %cst_101 {dimension_numbers = #tpu.dot_dimension_numbers<[1], [0], [0], [1], [0, 0, 1, 1], [], []>} : vector<16x16xbf16>, vector<16x48xbf16>, vector<16x48xf32> -> vector<16x48xf32>
    %166 = arith.addf %161, %165 : vector<16x48xf32>
    %167 = vector.extract_strided_slice %5 {offsets = [32, 0], sizes = [16, 16], strides = [1, 1]} : vector<54x16xbf16> to vector<16x16xbf16>
    %c32 = arith.constant 32 : index
    %c0_102 = arith.constant 0 : index
    %c0_103 = arith.constant 0 : index
    %168 = vector.load %arg4[%c32, %c0_102, %c0_103] : memref<39x16x48xbf16, #tpu.memory_space<vmem>>, vector<1x16x48xbf16>
    %169 = vector.shape_cast %168 : vector<1x16x48xbf16> to vector<16x48xbf16>
    %cst_104 = arith.constant dense<0.000000e+00> : vector<16x48xf32>
    %170 = tpu.matmul %167, %169, %cst_104 {dimension_numbers = #tpu.dot_dimension_numbers<[1], [0], [0], [1], [0, 0, 1, 1], [], []>} : vector<16x16xbf16>, vector<16x48xbf16>, vector<16x48xf32> -> vector<16x48xf32>
    %171 = arith.addf %166, %170 : vector<16x48xf32>
    %172 = vector.extract_strided_slice %5 {offsets = [33, 0], sizes = [16, 16], strides = [1, 1]} : vector<54x16xbf16> to vector<16x16xbf16>
    %c33 = arith.constant 33 : index
    %c0_105 = arith.constant 0 : index
    %c0_106 = arith.constant 0 : index
    %173 = vector.load %arg4[%c33, %c0_105, %c0_106] : memref<39x16x48xbf16, #tpu.memory_space<vmem>>, vector<1x16x48xbf16>
    %174 = vector.shape_cast %173 : vector<1x16x48xbf16> to vector<16x48xbf16>
    %cst_107 = arith.constant dense<0.000000e+00> : vector<16x48xf32>
    %175 = tpu.matmul %172, %174, %cst_107 {dimension_numbers = #tpu.dot_dimension_numbers<[1], [0], [0], [1], [0, 0, 1, 1], [], []>} : vector<16x16xbf16>, vector<16x48xbf16>, vector<16x48xf32> -> vector<16x48xf32>
    %176 = arith.addf %171, %175 : vector<16x48xf32>
    %177 = vector.extract_strided_slice %5 {offsets = [34, 0], sizes = [16, 16], strides = [1, 1]} : vector<54x16xbf16> to vector<16x16xbf16>
    %c34 = arith.constant 34 : index
    %c0_108 = arith.constant 0 : index
    %c0_109 = arith.constant 0 : index
    %178 = vector.load %arg4[%c34, %c0_108, %c0_109] : memref<39x16x48xbf16, #tpu.memory_space<vmem>>, vector<1x16x48xbf16>
    %179 = vector.shape_cast %178 : vector<1x16x48xbf16> to vector<16x48xbf16>
    %cst_110 = arith.constant dense<0.000000e+00> : vector<16x48xf32>
    %180 = tpu.matmul %177, %179, %cst_110 {dimension_numbers = #tpu.dot_dimension_numbers<[1], [0], [0], [1], [0, 0, 1, 1], [], []>} : vector<16x16xbf16>, vector<16x48xbf16>, vector<16x48xf32> -> vector<16x48xf32>
    %181 = arith.addf %176, %180 : vector<16x48xf32>
    %182 = vector.extract_strided_slice %5 {offsets = [35, 0], sizes = [16, 16], strides = [1, 1]} : vector<54x16xbf16> to vector<16x16xbf16>
    %c35 = arith.constant 35 : index
    %c0_111 = arith.constant 0 : index
    %c0_112 = arith.constant 0 : index
    %183 = vector.load %arg4[%c35, %c0_111, %c0_112] : memref<39x16x48xbf16, #tpu.memory_space<vmem>>, vector<1x16x48xbf16>
    %184 = vector.shape_cast %183 : vector<1x16x48xbf16> to vector<16x48xbf16>
    %cst_113 = arith.constant dense<0.000000e+00> : vector<16x48xf32>
    %185 = tpu.matmul %182, %184, %cst_113 {dimension_numbers = #tpu.dot_dimension_numbers<[1], [0], [0], [1], [0, 0, 1, 1], [], []>} : vector<16x16xbf16>, vector<16x48xbf16>, vector<16x48xf32> -> vector<16x48xf32>
    %186 = arith.addf %181, %185 : vector<16x48xf32>
    %187 = vector.extract_strided_slice %5 {offsets = [36, 0], sizes = [16, 16], strides = [1, 1]} : vector<54x16xbf16> to vector<16x16xbf16>
    %c36 = arith.constant 36 : index
    %c0_114 = arith.constant 0 : index
    %c0_115 = arith.constant 0 : index
    %188 = vector.load %arg4[%c36, %c0_114, %c0_115] : memref<39x16x48xbf16, #tpu.memory_space<vmem>>, vector<1x16x48xbf16>
    %189 = vector.shape_cast %188 : vector<1x16x48xbf16> to vector<16x48xbf16>
    %cst_116 = arith.constant dense<0.000000e+00> : vector<16x48xf32>
    %190 = tpu.matmul %187, %189, %cst_116 {dimension_numbers = #tpu.dot_dimension_numbers<[1], [0], [0], [1], [0, 0, 1, 1], [], []>} : vector<16x16xbf16>, vector<16x48xbf16>, vector<16x48xf32> -> vector<16x48xf32>
    %191 = arith.addf %186, %190 : vector<16x48xf32>
    %192 = vector.extract_strided_slice %5 {offsets = [37, 0], sizes = [16, 16], strides = [1, 1]} : vector<54x16xbf16> to vector<16x16xbf16>
    %c37 = arith.constant 37 : index
    %c0_117 = arith.constant 0 : index
    %c0_118 = arith.constant 0 : index
    %193 = vector.load %arg4[%c37, %c0_117, %c0_118] : memref<39x16x48xbf16, #tpu.memory_space<vmem>>, vector<1x16x48xbf16>
    %194 = vector.shape_cast %193 : vector<1x16x48xbf16> to vector<16x48xbf16>
    %cst_119 = arith.constant dense<0.000000e+00> : vector<16x48xf32>
    %195 = tpu.matmul %192, %194, %cst_119 {dimension_numbers = #tpu.dot_dimension_numbers<[1], [0], [0], [1], [0, 0, 1, 1], [], []>} : vector<16x16xbf16>, vector<16x48xbf16>, vector<16x48xf32> -> vector<16x48xf32>
    %196 = arith.addf %191, %195 : vector<16x48xf32>
    %197 = vector.extract_strided_slice %5 {offsets = [38, 0], sizes = [16, 16], strides = [1, 1]} : vector<54x16xbf16> to vector<16x16xbf16>
    %c38 = arith.constant 38 : index
    %c0_120 = arith.constant 0 : index
    %c0_121 = arith.constant 0 : index
    %198 = vector.load %arg4[%c38, %c0_120, %c0_121] : memref<39x16x48xbf16, #tpu.memory_space<vmem>>, vector<1x16x48xbf16>
    %199 = vector.shape_cast %198 : vector<1x16x48xbf16> to vector<16x48xbf16>
    %cst_122 = arith.constant dense<0.000000e+00> : vector<16x48xf32>
    %200 = tpu.matmul %197, %199, %cst_122 {dimension_numbers = #tpu.dot_dimension_numbers<[1], [0], [0], [1], [0, 0, 1, 1], [], []>} : vector<16x16xbf16>, vector<16x48xbf16>, vector<16x48xf32> -> vector<16x48xf32>
    %201 = arith.addf %196, %200 : vector<16x48xf32>
    %c0_123 = arith.constant 0 : index
    %c0_124 = arith.constant 0 : index
    %202 = vector.load %arg5[%c0_123, %c0_124] : memref<1x48xf32, #tpu.memory_space<vmem>>, vector<1x48xf32>
    %203 = vector.broadcast %202 : vector<1x48xf32> to vector<16x48xf32>
    %204 = arith.mulf %201, %203 : vector<16x48xf32>
    %c0_125 = arith.constant 0 : index
    %c0_126 = arith.constant 0 : index
    %205 = vector.load %arg6[%c0_125, %c0_126] : memref<1x48xf32, #tpu.memory_space<vmem>>, vector<1x48xf32>
    %206 = vector.broadcast %205 : vector<1x48xf32> to vector<16x48xf32>
    %207 = arith.addf %204, %206 : vector<16x48xf32>
    %cst_127 = arith.constant 0.000000e+00 : f32
    %208 = vector.broadcast %cst_127 : f32 to vector<16x48xf32>
    %209 = arith.maximumf %207, %208 : vector<16x48xf32>
    %210 = arith.truncf %209 : vector<16x48xf32> to vector<16x48xbf16>
    %c0_128 = arith.constant 0 : index
    %c0_129 = arith.constant 0 : index
    %c0_130 = arith.constant 0 : index
    %211 = vector.load %arg9[%c0_128, %c0_129, %c0_130] : memref<1x16x48xbf16, #tpu.memory_space<vmem>>, vector<1x16x48xbf16>
    %212 = vector.shape_cast %211 : vector<1x16x48xbf16> to vector<16x48xbf16>
    %213 = vector.shape_cast %210 : vector<16x48xbf16> to vector<1x16x48xbf16>
    tpu.vector_store %arg9[%c0_128, %c0_129, %c0_130], %213 {strides = array<i32>} : memref<1x16x48xbf16, #tpu.memory_space<vmem>>, vector<1x16x48xbf16>,
    %214 = vector.extract_strided_slice %1 {offsets = [19, 0], sizes = [16, 4], strides = [1, 1]} : vector<54x4xf32> to vector<16x4xf32>
    %215 = vector.extract_strided_slice %1 {offsets = [18, 0], sizes = [16, 4], strides = [1, 1]} : vector<54x4xf32> to vector<16x4xf32>
    %216 = vector.extract_strided_slice %1 {offsets = [20, 0], sizes = [16, 4], strides = [1, 1]} : vector<54x4xf32> to vector<16x4xf32>
    %217 = tpu.iota {dimensions = array<i32: 0>} : vector<16x1xi32>
    %c0_i32 = arith.constant 0 : i32
    %218 = vector.broadcast %c0_i32 : i32 to vector<16x1xi32>
    %219 = arith.cmpi eq, %217, %218 : vector<16x1xi32>
    %220 = vector.shape_cast %219 : vector<16x1xi1> to vector<16x1xi1>
    %221 = vector.broadcast %220 : vector<16x1xi1> to vector<16x4xi1>
    %222 = arith.select %221, %214, %215 : vector<16x4xi1>, vector<16x4xf32>
    %c15_i32 = arith.constant 15 : i32
    %223 = vector.broadcast %c15_i32 : i32 to vector<16x1xi32>
    %224 = arith.cmpi eq, %217, %223 : vector<16x1xi32>
    %225 = vector.shape_cast %224 : vector<16x1xi1> to vector<16x1xi1>
    %226 = vector.broadcast %225 : vector<16x1xi1> to vector<16x4xi1>
    %227 = arith.select %226, %214, %216 : vector<16x4xi1>, vector<16x4xf32>
    %228 = arith.maximumf %214, %222 : vector<16x4xf32>
    %229 = arith.maximumf %228, %227 : vector<16x4xf32>
    %230 = arith.truncf %229 : vector<16x4xf32> to vector<16x4xbf16>
    %c0_131 = arith.constant 0 : index
    %c0_132 = arith.constant 0 : index
    %231 = vector.load %arg3[%c0_131, %c0_132] : memref<4x16xbf16, #tpu.memory_space<vmem>>, vector<4x16xbf16>
    %cst_133 = arith.constant dense<0.000000e+00> : vector<16x16xf32>
    %232 = tpu.matmul %230, %231, %cst_133 {dimension_numbers = #tpu.dot_dimension_numbers<[1], [0], [0], [1], [0, 0, 1, 1], [], []>} : vector<16x4xbf16>, vector<4x16xbf16>, vector<16x16xf32> -> vector<16x16xf32>
    %c0_134 = arith.constant 0 : index
    %c0_135 = arith.constant 0 : index
    %233 = vector.load %arg7[%c0_134, %c0_135] : memref<1x16xf32, #tpu.memory_space<vmem>>, vector<1x16xf32>
    %234 = vector.broadcast %233 : vector<1x16xf32> to vector<16x16xf32>
    %235 = arith.mulf %232, %234 : vector<16x16xf32>
    %c0_136 = arith.constant 0 : index
    %c0_137 = arith.constant 0 : index
    %236 = vector.load %arg8[%c0_136, %c0_137] : memref<1x16xf32, #tpu.memory_space<vmem>>, vector<1x16xf32>
    %237 = vector.broadcast %236 : vector<1x16xf32> to vector<16x16xf32>
    %238 = arith.addf %235, %237 : vector<16x16xf32>
    %cst_138 = arith.constant 0.000000e+00 : f32
    %239 = vector.broadcast %cst_138 : f32 to vector<16x16xf32>
    %240 = arith.maximumf %238, %239 : vector<16x16xf32>
    %241 = arith.truncf %240 : vector<16x16xf32> to vector<16x16xbf16>
    %c0_139 = arith.constant 0 : index
    %c0_140 = arith.constant 0 : index
    %c0_141 = arith.constant 0 : index
    %242 = vector.load %arg10[%c0_139, %c0_140, %c0_141] : memref<1x16x16xbf16, #tpu.memory_space<vmem>>, vector<1x16x16xbf16>
    %243 = vector.shape_cast %242 : vector<1x16x16xbf16> to vector<16x16xbf16>
    %244 = vector.shape_cast %241 : vector<16x16xbf16> to vector<1x16x16xbf16>
    tpu.vector_store %arg10[%c0_139, %c0_140, %c0_141], %244 {strides = array<i32>} : memref<1x16x16xbf16, #tpu.memory_space<vmem>>, vector<1x16x16xbf16>,
    return
  }
  func.func @transform_0(%arg0: i32) -> (i32, i32, i32) {
    %c0_i32 = arith.constant 0 : i32
    %c0_i32_0 = arith.constant 0 : i32
    %c0_i32_1 = arith.constant 0 : i32
    return %arg0, %c0_i32, %c0_i32_0 : i32, i32, i32
  }
  func.func @transform_1(%arg0: i32) -> (i32, i32) {
    %c0_i32 = arith.constant 0 : i32
    %c0_i32_0 = arith.constant 0 : i32
    %c0_i32_1 = arith.constant 0 : i32
    return %c0_i32, %c0_i32_0 : i32, i32
  }
  func.func @transform_2(%arg0: i32) -> (i32, i32) {
    %c0_i32 = arith.constant 0 : i32
    %c0_i32_0 = arith.constant 0 : i32
    %c0_i32_1 = arith.constant 0 : i32
    return %c0_i32, %c0_i32_0 : i32, i32
  }
  func.func @transform_3(%arg0: i32) -> (i32, i32, i32) {
    %c0_i32 = arith.constant 0 : i32
    %c0_i32_0 = arith.constant 0 : i32
    %c0_i32_1 = arith.constant 0 : i32
    %c0_i32_2 = arith.constant 0 : i32
    return %c0_i32, %c0_i32_0, %c0_i32_1 : i32, i32, i32
  }
  func.func @transform_4(%arg0: i32) -> (i32, i32) {
    %c0_i32 = arith.constant 0 : i32
    %c0_i32_0 = arith.constant 0 : i32
    %c0_i32_1 = arith.constant 0 : i32
    return %c0_i32, %c0_i32_0 : i32, i32
  }
  func.func @transform_5(%arg0: i32) -> (i32, i32) {
    %c0_i32 = arith.constant 0 : i32
    %c0_i32_0 = arith.constant 0 : i32
    %c0_i32_1 = arith.constant 0 : i32
    return %c0_i32, %c0_i32_0 : i32, i32
  }
  func.func @transform_6(%arg0: i32) -> (i32, i32) {
    %c0_i32 = arith.constant 0 : i32
    %c0_i32_0 = arith.constant 0 : i32
    %c0_i32_1 = arith.constant 0 : i32
    return %c0_i32, %c0_i32_0 : i32, i32
  }
  func.func @transform_7(%arg0: i32) -> (i32, i32) {
    %c0_i32 = arith.constant 0 : i32
    %c0_i32_0 = arith.constant 0 : i32
    %c0_i32_1 = arith.constant 0 : i32
    return %c0_i32, %c0_i32_0 : i32, i32
  }
  func.func @transform_8(%arg0: i32) -> (i32, i32, i32) {
    %c0_i32 = arith.constant 0 : i32
    %c0_i32_0 = arith.constant 0 : i32
    %c0_i32_1 = arith.constant 0 : i32
    return %arg0, %c0_i32, %c0_i32_0 : i32, i32, i32
  }
  func.func @transform_9(%arg0: i32) -> (i32, i32, i32) {
    %c0_i32 = arith.constant 0 : i32
    %c0_i32_0 = arith.constant 0 : i32
    %c0_i32_1 = arith.constant 0 : i32
    return %arg0, %c0_i32, %c0_i32_0 : i32, i32, i32
  }
}

module attributes {stable_mosaic.version = 11 : i64} {
  func.func @_attention_kernel(%arg0: i32, %arg1: memref<8x16x16xbf16, #tpu.memory_space<vmem>>, %arg2: memref<8x16x16xbf16, #tpu.memory_space<vmem>>, %arg3: memref<8x16x16xbf16, #tpu.memory_space<vmem>>, %arg4: memref<8x16x16xbf16, #tpu.memory_space<vmem>>, %arg5: memref<8x16x16xf32, #tpu.memory_space<vmem>>) attributes {dimension_semantics = [#tpu.dimension_semantics<parallel>], iteration_bounds = array<i64: 1>, scalar_prefetch = 0 : i64, scratch_operands = 0 : i64, tpu.core_type = #tpu.core_type<tc>, window_params = [{transform_indices = @transform_0, window_bounds = array<i64: 8, 16, 16>}, {transform_indices = @transform_1, window_bounds = array<i64: 8, 16, 16>}, {transform_indices = @transform_2, window_bounds = array<i64: 8, 16, 16>}, {transform_indices = @transform_3, window_bounds = array<i64: 8, 16, 16>}, {transform_indices = @transform_4, window_bounds = array<i64: 8, 16, 16>}]} {
    %c0 = arith.constant 0 : index
    %c0_0 = arith.constant 0 : index
    %c0_1 = arith.constant 0 : index
    %0 = vector.load %arg1[%c0, %c0_0, %c0_1] : memref<8x16x16xbf16, #tpu.memory_space<vmem>>, vector<8x16x16xbf16>
    %c0_2 = arith.constant 0 : index
    %c0_3 = arith.constant 0 : index
    %c0_4 = arith.constant 0 : index
    %1 = vector.load %arg2[%c0_2, %c0_3, %c0_4] : memref<8x16x16xbf16, #tpu.memory_space<vmem>>, vector<8x16x16xbf16>
    %c0_5 = arith.constant 0 : index
    %c0_6 = arith.constant 0 : index
    %c0_7 = arith.constant 0 : index
    %2 = vector.load %arg3[%c0_5, %c0_6, %c0_7] : memref<8x16x16xbf16, #tpu.memory_space<vmem>>, vector<8x16x16xbf16>
    "tpu.trace_start"() <{level = 10 : i32, message = "bqd,bkd->bqk"}> : () -> ()
    %cst = arith.constant dense<0.000000e+00> : vector<8x16x16xf32>
    %3 = tpu.matmul %0, %1, %cst {dimension_numbers = #tpu.dot_dimension_numbers<[2], [2], [1], [1], [0, 0, 0, 1, 1, 1], [0], [0]>} : vector<8x16x16xbf16>, vector<8x16x16xbf16>, vector<8x16x16xf32> -> vector<8x16x16xf32>
    "tpu.trace_stop"() : () -> ()
    %cst_8 = arith.constant 2.500000e-01 : f32
    %4 = vector.broadcast %cst_8 : f32 to vector<8x16x16xf32>
    %5 = arith.mulf %3, %4 : vector<8x16x16xf32>
    %cst_9 = arith.constant dense<0xFF800000> : vector<8x16xf32>
    %6 = vector.multi_reduction <maximumf>, %5, %cst_9 [2] : vector<8x16x16xf32> to vector<8x16xf32>
    %7 = vector.shape_cast %6 : vector<8x16xf32> to vector<8x16x1xf32>
    %8 = vector.broadcast %7 : vector<8x16x1xf32> to vector<8x16x16xf32>
    %9 = arith.subf %5, %8 : vector<8x16x16xf32>
    %10 = math.exp %9 : vector<8x16x16xf32>
    %cst_10 = arith.constant dense<0.000000e+00> : vector<8x16xf32>
    %11 = vector.multi_reduction <add>, %10, %cst_10 [2] : vector<8x16x16xf32> to vector<8x16xf32>
    %12 = vector.shape_cast %11 : vector<8x16xf32> to vector<8x16x1xf32>
    %13 = tpu.reciprocal %12 {approx = true} : vector<8x16x1xf32> -> vector<8x16x1xf32>
    %14 = vector.broadcast %13 : vector<8x16x1xf32> to vector<8x16x16xf32>
    %15 = arith.mulf %10, %14 : vector<8x16x16xf32>
    %16 = arith.truncf %15 : vector<8x16x16xf32> to vector<8x16x16xbf16>
    "tpu.trace_start"() <{level = 10 : i32, message = "bqk,bkd->bqd"}> : () -> ()
    %cst_11 = arith.constant dense<0.000000e+00> : vector<8x16x16xf32>
    %17 = tpu.matmul %16, %2, %cst_11 {dimension_numbers = #tpu.dot_dimension_numbers<[2], [1], [1], [2], [0, 0, 0, 1, 1, 2], [0], [0]>} : vector<8x16x16xbf16>, vector<8x16x16xbf16>, vector<8x16x16xf32> -> vector<8x16x16xf32>
    "tpu.trace_stop"() : () -> ()
    %18 = arith.truncf %17 : vector<8x16x16xf32> to vector<8x16x16xbf16>
    %c0_12 = arith.constant 0 : index
    %c0_13 = arith.constant 0 : index
    %c0_14 = arith.constant 0 : index
    %19 = vector.load %arg4[%c0_12, %c0_13, %c0_14] : memref<8x16x16xbf16, #tpu.memory_space<vmem>>, vector<8x16x16xbf16>
    tpu.vector_store %arg4[%c0_12, %c0_13, %c0_14], %18 {strides = array<i32>} : memref<8x16x16xbf16, #tpu.memory_space<vmem>>, vector<8x16x16xbf16>,
    %c0_15 = arith.constant 0 : index
    %c0_16 = arith.constant 0 : index
    %c0_17 = arith.constant 0 : index
    %20 = vector.load %arg5[%c0_15, %c0_16, %c0_17] : memref<8x16x16xf32, #tpu.memory_space<vmem>>, vector<8x16x16xf32>
    tpu.vector_store %arg5[%c0_15, %c0_16, %c0_17], %15 {strides = array<i32>} : memref<8x16x16xf32, #tpu.memory_space<vmem>>, vector<8x16x16xf32>,
    return
  }
  func.func @transform_0(%arg0: i32) -> (i32, i32, i32) {
    %c0_i32 = arith.constant 0 : i32
    %c0_i32_0 = arith.constant 0 : i32
    %c0_i32_1 = arith.constant 0 : i32
    return %arg0, %c0_i32, %c0_i32_0 : i32, i32, i32
  }
  func.func @transform_1(%arg0: i32) -> (i32, i32, i32) {
    %c0_i32 = arith.constant 0 : i32
    %c0_i32_0 = arith.constant 0 : i32
    %c0_i32_1 = arith.constant 0 : i32
    return %arg0, %c0_i32, %c0_i32_0 : i32, i32, i32
  }
  func.func @transform_2(%arg0: i32) -> (i32, i32, i32) {
    %c0_i32 = arith.constant 0 : i32
    %c0_i32_0 = arith.constant 0 : i32
    %c0_i32_1 = arith.constant 0 : i32
    return %arg0, %c0_i32, %c0_i32_0 : i32, i32, i32
  }
  func.func @transform_3(%arg0: i32) -> (i32, i32, i32) {
    %c0_i32 = arith.constant 0 : i32
    %c0_i32_0 = arith.constant 0 : i32
    %c0_i32_1 = arith.constant 0 : i32
    return %arg0, %c0_i32, %c0_i32_0 : i32, i32, i32
  }
  func.func @transform_4(%arg0: i32) -> (i32, i32, i32) {
    %c0_i32 = arith.constant 0 : i32
    %c0_i32_0 = arith.constant 0 : i32
    %c0_i32_1 = arith.constant 0 : i32
    return %arg0, %c0_i32, %c0_i32_0 : i32, i32, i32
  }
}

module attributes {stable_mosaic.version = 11 : i64} {
  func.func @_conv1d_same_kernel(%arg0: i32, %arg1: memref<1x18x64xbf16, #tpu.memory_space<vmem>>, %arg2: memref<3x64x64xbf16, #tpu.memory_space<vmem>>, %arg3: memref<1x64xf32, #tpu.memory_space<vmem>>, %arg4: memref<1x16x64xf32, #tpu.memory_space<vmem>>) attributes {dimension_semantics = [#tpu.dimension_semantics<parallel>], iteration_bounds = array<i64: 2>, scalar_prefetch = 0 : i64, scratch_operands = 0 : i64, tpu.core_type = #tpu.core_type<tc>, window_params = [{transform_indices = @transform_0, window_bounds = array<i64: 1, 18, 64>}, {pipeline_mode = #tpu.pipeline_mode<synchronous>, transform_indices = @transform_1, window_bounds = array<i64: 3, 64, 64>}, {pipeline_mode = #tpu.pipeline_mode<synchronous>, transform_indices = @transform_2, window_bounds = array<i64: 1, 64>}, {transform_indices = @transform_3, window_bounds = array<i64: 1, 16, 64>}]} {
    %c0 = arith.constant 0 : index
    %c0_0 = arith.constant 0 : index
    %c0_1 = arith.constant 0 : index
    %0 = vector.load %arg1[%c0, %c0_0, %c0_1] : memref<1x18x64xbf16, #tpu.memory_space<vmem>>, vector<1x18x64xbf16>
    %1 = vector.shape_cast %0 : vector<1x18x64xbf16> to vector<18x64xbf16>
    %cst = arith.constant 0.000000e+00 : f32
    %2 = vector.broadcast %cst : f32 to vector<16x64xf32>
    %3 = vector.extract_strided_slice %1 {offsets = [0, 0], sizes = [16, 64], strides = [1, 1]} : vector<18x64xbf16> to vector<16x64xbf16>
    %c0_2 = arith.constant 0 : index
    %c0_3 = arith.constant 0 : index
    %c0_4 = arith.constant 0 : index
    %4 = vector.load %arg2[%c0_2, %c0_3, %c0_4] : memref<3x64x64xbf16, #tpu.memory_space<vmem>>, vector<1x64x64xbf16>
    %5 = vector.shape_cast %4 : vector<1x64x64xbf16> to vector<64x64xbf16>
    %cst_5 = arith.constant dense<0.000000e+00> : vector<16x64xf32>
    %6 = tpu.matmul %3, %5, %cst_5 {dimension_numbers = #tpu.dot_dimension_numbers<[1], [0], [0], [1], [0, 0, 1, 1], [], []>} : vector<16x64xbf16>, vector<64x64xbf16>, vector<16x64xf32> -> vector<16x64xf32>
    %7 = arith.addf %2, %6 : vector<16x64xf32>
    %8 = vector.extract_strided_slice %1 {offsets = [1, 0], sizes = [16, 64], strides = [1, 1]} : vector<18x64xbf16> to vector<16x64xbf16>
    %c1 = arith.constant 1 : index
    %c0_6 = arith.constant 0 : index
    %c0_7 = arith.constant 0 : index
    %9 = vector.load %arg2[%c1, %c0_6, %c0_7] : memref<3x64x64xbf16, #tpu.memory_space<vmem>>, vector<1x64x64xbf16>
    %10 = vector.shape_cast %9 : vector<1x64x64xbf16> to vector<64x64xbf16>
    %cst_8 = arith.constant dense<0.000000e+00> : vector<16x64xf32>
    %11 = tpu.matmul %8, %10, %cst_8 {dimension_numbers = #tpu.dot_dimension_numbers<[1], [0], [0], [1], [0, 0, 1, 1], [], []>} : vector<16x64xbf16>, vector<64x64xbf16>, vector<16x64xf32> -> vector<16x64xf32>
    %12 = arith.addf %7, %11 : vector<16x64xf32>
    %13 = vector.extract_strided_slice %1 {offsets = [2, 0], sizes = [16, 64], strides = [1, 1]} : vector<18x64xbf16> to vector<16x64xbf16>
    %c2 = arith.constant 2 : index
    %c0_9 = arith.constant 0 : index
    %c0_10 = arith.constant 0 : index
    %14 = vector.load %arg2[%c2, %c0_9, %c0_10] : memref<3x64x64xbf16, #tpu.memory_space<vmem>>, vector<1x64x64xbf16>
    %15 = vector.shape_cast %14 : vector<1x64x64xbf16> to vector<64x64xbf16>
    %cst_11 = arith.constant dense<0.000000e+00> : vector<16x64xf32>
    %16 = tpu.matmul %13, %15, %cst_11 {dimension_numbers = #tpu.dot_dimension_numbers<[1], [0], [0], [1], [0, 0, 1, 1], [], []>} : vector<16x64xbf16>, vector<64x64xbf16>, vector<16x64xf32> -> vector<16x64xf32>
    %17 = arith.addf %12, %16 : vector<16x64xf32>
    %c0_12 = arith.constant 0 : index
    %c0_13 = arith.constant 0 : index
    %18 = vector.load %arg3[%c0_12, %c0_13] : memref<1x64xf32, #tpu.memory_space<vmem>>, vector<1x64xf32>
    %19 = vector.broadcast %18 : vector<1x64xf32> to vector<16x64xf32>
    %20 = arith.addf %17, %19 : vector<16x64xf32>
    %c0_14 = arith.constant 0 : index
    %c0_15 = arith.constant 0 : index
    %c0_16 = arith.constant 0 : index
    %21 = vector.load %arg4[%c0_14, %c0_15, %c0_16] : memref<1x16x64xf32, #tpu.memory_space<vmem>>, vector<1x16x64xf32>
    %22 = vector.shape_cast %21 : vector<1x16x64xf32> to vector<16x64xf32>
    %23 = vector.shape_cast %20 : vector<16x64xf32> to vector<1x16x64xf32>
    tpu.vector_store %arg4[%c0_14, %c0_15, %c0_16], %23 {strides = array<i32>} : memref<1x16x64xf32, #tpu.memory_space<vmem>>, vector<1x16x64xf32>,
    return
  }
  func.func @transform_0(%arg0: i32) -> (i32, i32, i32) {
    %c0_i32 = arith.constant 0 : i32
    %c0_i32_0 = arith.constant 0 : i32
    %c0_i32_1 = arith.constant 0 : i32
    return %arg0, %c0_i32, %c0_i32_0 : i32, i32, i32
  }
  func.func @transform_1(%arg0: i32) -> (i32, i32, i32) {
    %c0_i32 = arith.constant 0 : i32
    %c0_i32_0 = arith.constant 0 : i32
    %c0_i32_1 = arith.constant 0 : i32
    %c0_i32_2 = arith.constant 0 : i32
    return %c0_i32, %c0_i32_0, %c0_i32_1 : i32, i32, i32
  }
  func.func @transform_2(%arg0: i32) -> (i32, i32) {
    %c0_i32 = arith.constant 0 : i32
    %c0_i32_0 = arith.constant 0 : i32
    %c0_i32_1 = arith.constant 0 : i32
    return %c0_i32, %c0_i32_0 : i32, i32
  }
  func.func @transform_3(%arg0: i32) -> (i32, i32, i32) {
    %c0_i32 = arith.constant 0 : i32
    %c0_i32_0 = arith.constant 0 : i32
    %c0_i32_1 = arith.constant 0 : i32
    return %arg0, %c0_i32, %c0_i32_0 : i32, i32, i32
  }
}

</mosaic_0001>

<bundles_post_ra>
// kernel: inception_self_atten.9
= control target key start
LH: loop header
LB: loop body
LE: loop exit
PB: predicated region body
PF: predicated region fallthrough
CT: control target
= control target key end

     0   :  { %8 = vsyncpa [#allocation3], 0  ;;  %s911_s0 = inlined_call_operand.vmem [shape: bf16[2,18,64], index: 0, kind: input, shape index: {}]   ;;  %s912_s1 = inlined_call_operand.vmem [shape: bf16[3,64,64], index: 1, kind: input, shape index: {}]   ;;  %s913_s2 = inlined_call_operand.vmem [shape: f32[1,64], index: 2, kind: input, shape index: {}]   ;;  %s914_s3 = inlined_call_operand.hbm [shape: f32[2,16,64], index: 3, kind: output, shape index: {}]  }
   0x1   :  { %10 = vsyncpa [#allocation3 + $0x1], 0  ;;  %s761_s12 = smov 0   ;;  %s763_s13 = smov 0  }
   0x2   :  { %s765_s14 = smov 0   ;;  %s767_s15 = smov 0  }
   0x3 LB: > { %s782_s16 = sadd.s32 4294967295, %s734_s15   ;;  %s517_s17 = sadd.s32 4294967294, %s734_s15   ;;  %s734_s15 = sphi %s767_s15, %s920_s15   ;;  %s730_s14 = sphi %s765_s14, %s919_s14   ;;  %s726_s13 = sphi %s763_s13, %s918_s13   ;;  %s722_s12 = sphi %s761_s12, %s917_s12  }
   0x4   : > { %s786_s18 = sadd.s32 1, %s734_s15   ;;  %s91_s19 = sadd.s32 1, %s730_s14 }
   0x5   : > { %s88_s20 = ssub.s32 %s734_s15, %s786_s18  ;;  %p101_p0 = scmp.ne.s32.totalorder %s730_s14, %s726_s13 }
   0x6   : > { %p89_p1 = scmp.eq.s32.totalorder %s88_s20, 0  ;;  %p102_p2 = scmp.eq.s32.totalorder %s782_s16, 1 }
   0x7   : > { %p107_p3 = scmp.ne.s32.totalorder %s726_s13, %s722_s12  ;;  %p108_p4 = scmp.eq.s32.totalorder %s517_s17, 1 }
   0x8   : > { %s797_s21 = scalar_select %p89_p1, %s730_s14, %s91_s19  }
   0x9   : > { %p799_p5 = por %p102_p2, %p101_p0  ;;  %p803_p6 = por %p108_p4, %p107_p3 }
   0xa   : > { %p520_p7 = scmp.ge.s32.totalorder %s734_s15, 1  ;;  %p140_p8 = scmp.lt.s32.totalorder %s734_s15, 3 }
   0xc   : > { %p141_p9 = pnand %p520_p7, %p140_p8 }
   0xd   : > { %v658_v0 = vld [vmem:[%s912_s1 + $0x20] sm:$0xff] (!%p141_p9)   ;;  %v736_v1 = vmov (!%p141_p9), 0.0   ;;  %v660_v3 = vld [vmem:[%s912_s1 + $0x28] sm:$0xff] (!%p141_p9)   ;;  %vm737_vm0 = vmmov (!%p141_p9), 0   ;;  %p164_p10 = scmp.lt.s32.totalorder (!%p141_p9), %s782_s16, 1  ;;  %v662_v5 = vld [vmem:[%s912_s1 + $0x30] sm:$0xff] (!%p141_p9)  }
   0xe   : > { %144 = sbr.rel (%p141_p9) target bundleno = 283 (0x11b), region = 32  ;;  %578 = vmatprep.subr.bf16.mxu0 (!%p141_p9), %v736_v1  ;;  %590 = vmatprep.subr.bf16.mxu1 (!%p141_p9), %v736_v1  ;;  %v659_v2 = vld [vmem:[%s912_s1] sm:$0xff] (!%p141_p9)   ;;  %v661_v4 = vld [vmem:[%s912_s1 + $0x8] sm:$0xff] (!%p141_p9)   ;;  %v663_v6 = vld [vmem:[%s912_s1 + $0x10] sm:$0xff] (!%p141_p9)   ;;  %vm198_vm1 = vsmask.f32 (!%p141_p9), 7424 }
   0xf   : > { %579 = vmatpush3.bf16.msra.mxu0 (!%p141_p9), %v658_v0  ;;  %586 = vmatprep.mubr.msk.bf16.mxu0 (!%p141_p9), %vm737_vm0, %v736_v1  ;;  %v664_v7 = vld [vmem:[%s912_s1 + $0x38] sm:$0xff] (!%p141_p9)   ;;  %vm235_vm2 = vcmask (!%p141_p9), 523264   ;;  %v668_v17 = vld [vmem:[%s912_s1 + $0x40] sm:$0xff] (!%p141_p9)   ;;  %v669_v19 = vld [vmem:[%s912_s1 + $0x48] sm:$0xff] (!%p141_p9)   ;;  %vm356_vm3 = vcmask (!%p141_p9), 1046528   ;;  %s562_s20 = sshll.u32 (!%p141_p9), %s782_s16, 8 }
  0x10   : > { %591 = vmatpush3.bf16.msra.mxu1 (!%p141_p9), %v659_v2  ;;  %580 = vmatprep.subr.bf16.mxu0 (!%p141_p9), %v736_v1  ;;  %v665_v10 = vld [vmem:[%s912_s1 + $0x18] sm:$0xff] (!%p141_p9)   ;;  %v670_v20 = vld [vmem:[%s912_s1 + $0x50] sm:$0xff] (!%p141_p9)   ;;  %v556_v36 = vld [vmem:[%s913_s2] ss:$0 sm:$0xff] (!%p141_p9)  ;;  %s864_s26 = scalar_lea.hbm (!%p141_p9), %s914_s3, %s562_s20  ;;  %s738_s28 = smov (!%p141_p9), [#allocation2]  }
  0x11   : > { %592 = vmatprep.subr.bf16.mxu1 (!%p141_p9), %v736_v1  ;;  %598 = vmatprep.mubr.msk.bf16.mxu1 (!%p141_p9), %vm737_vm0, %v736_v1  ;;  %v671_v21 = vld [vmem:[%s912_s1 + $0x58] sm:$0xff] (!%p141_p9)   ;;  %s676_s29 = sshll.u32 (!%p141_p9), %s738_s28, 4  ;;  %s677_s29 = int_to_ptr.vmem [resolvable:$false] %s676_s29 }
  0x12   : > { %s678_s30 = scalar_lea.vmem (!%p141_p9), %s677_s29, 512 }
  0x13   : > { %581 = vmatpush3.bf16.msra.mxu0 (!%p141_p9), %v660_v3 }
  0x14   : > { %593 = vmatpush3.bf16.msra.mxu1 (!%p141_p9), %v661_v4  ;;  %582 = vmatprep.subr.bf16.mxu0 (!%p141_p9), %v736_v1 }
  0x15   : > { %s165_s5 = scalar_select %p164_p10, %s782_s16, 1  ;;  %594 = vmatprep.subr.bf16.mxu1 %v736_v1 }
  0x17   : > { %s614_s8 = smul.u32 12, %s165_s5  ;;  %583 = vmatpush3.bf16.msra.mxu0 %v662_v5 }
  0x18   : > { %595 = vmatpush3.bf16.msra.mxu1 %v663_v6  ;;  %584 = vmatprep.subr.bf16.mxu0 %v736_v1 }
  0x19   : > { %s168_s19 = scalar_lea.vmem %s911_s0, %s614_s8  ;;  %596 = vmatprep.subr.bf16.mxu1 %v736_v1  ;;  %s161_s8 = sand.u32 1, %s726_s13  }
  0x1a   : > { %v666_v8 = vld [vmem:[%s168_s19] sm:$0xff]   ;;  %v667_v9 = vld [vmem:[%s168_s19 + $0x8] ss:$0 sps:$4 sm:$0x11]   ;;  %s521_s9 = sshll.u32 %s161_s8, 4  ;;  %s870_s16 = scalar_lea.sflag [#allocation3], %s161_s8 }
  0x1b   : > { %v200_v11 = vshrl.u32 %v666_v8, 16  ;;  %v202_v12 = vshll.u32 %v666_v8, 16  ;;  %v207_v13 = vshll.u32 %v667_v9, 16  ;;  %585 = vmatpush3.bf16.msra.mxu0 %v664_v7  ;;  %v357_v22 = vrot.slane %v666_v8, 1  ;;  %s163_s17 = scalar_lea.vmem [#allocation2], %s521_s9 }
  0x1c   : > { %597 = vmatpush3.bf16.msra.mxu1 %v665_v10  ;;  %602 = vmatprep.subr.bf16.mxu0 %v736_v1  ;;  %v358_v23 = vrot.slane %v667_v9, 1  ;;  %s455_s19 = sshll.u32 %s163_s17, 4  ;;  %s866_s19 = int_to_ptr.vmem [resolvable:$true] %s455_s19 }
  0x1d   : > { %v204_v14 = vrot.slane %v202_v12, 1  ;;  %v209_v15 = vrot.slane %v207_v13, 1  ;;  %s672_s27 = scalar_lea.vmem %s866_s19, 256  ;;  %p679_p0 = scmp.lt.s32.totalorder %s866_s19, %s677_s29 }
  0x1e   : > { %v359_v24 = vsel %vm356_vm3, %v357_v22, %v358_v23  ;;  %p673_p11 = scmp.ne.s32.totalorder %s866_s19, %s672_s27  ;;  %p680_p1 = scmp.lt.s32.totalorder %s678_s30, %s672_s27 }
  0x1f   : > { %v205_v16 = vor.u32 %v204_v14, %v200_v11  ;;  %599 = vmatmul.mubr.msk.bf16.vlgmr.msra.gmra.mrb[0].mxu1 %vm235_vm2, %v666_v8 }
  0x20   : > { %p674_p12 = pnand %p673_p11, %p799_p5  ;;  %p681_p2 = por %p680_p1, %p679_p0 }
  0x21   : > { %v210_v18 = vsel %vm198_vm1, %v205_v16, %v209_v15 }
  0x22   : > { %587 = vmatmul.mubr.msk.bf16.vlgmr.msra.gmra.mrb[0].mxu0 %vm235_vm2, %v210_v18  ;;  %p675_p13 = pneg %p674_p12 }
  0x23   : > { %603 = vmatpush3.bf16.msra.mxu0 %v668_v17  ;;  %610 = vmatprep.mubr.msk.bf16.mxu0 %vm737_vm0, %v736_v1 }
  0x24   : > { %604 = vmatprep.subr.bf16.mxu0 %v736_v1  ;;  %p682_p3 = pnand %p681_p2, %p675_p13 }
  0x27   : > { %605 = vmatpush3.bf16.msra.mxu0 %v669_v19 }
  0x28   : > { %606 = vmatprep.subr.bf16.mxu0 %v736_v1 }
  0x2b   : > { %607 = vmatpush3.bf16.msra.mxu0 %v670_v20 }
  0x2c   : > { %608 = vmatprep.subr.bf16.mxu0 %v736_v1 }
  0x2f   : > { %609 = vmatpush3.bf16.msra.mxu0 %v671_v21 }
  0x32   : > { %611 = vmatmul.mubr.msk.bf16.vlgmr.msra.gmra.mrb[4].mxu0 %vm235_vm2, %v359_v24 }
  0xf2   : > { %v340_v25 = vpop.f32.mrb[0].mxu1 }
  0xf3   : > { %v600_v27 = vpop.f32.mrb[1].mxu1 }
  0xf4   : > { %v343_v30 = vpop.f32.mrb[2].mxu1 }
  0xf5   : > { %v273_v26 = vpop.f32.mrb[0].mxu0  ;;  %v601_v32 = vpop.f32.mrb[3].mxu1 }
  0xf6   : > { %v341_v28 = vadd.f32 %v340_v25, %v273_v26  ;;  %v588_v29 = vpop.f32.mrb[1].mxu0 }
  0xf7   : > { %v276_v31 = vpop.f32.mrb[2].mxu0 }
  0xf8   : > { %v344_v33 = vadd.f32 %v343_v30, %v276_v31  ;;  %v589_v34 = vpop.f32.mrb[3].mxu0 }
 0x105   : > { %v421_v35 = vpop.f32.mrb[4].mxu0 }
 0x106   : > { %v428_v37 = vadd.f32 %v421_v35, %v341_v28  ;;  %v612_v38 = vpop.f32.mrb[5].mxu0 }
 0x107   : > { %v424_v39 = vpop.f32.mrb[6].mxu0 }
 0x108   : > { %v437_v40 = vadd.f32 %v556_v36, %v428_v37  ;;  %v429_v41 = vadd.f32 %v424_v39, %v344_v33  ;;  %v613_v42 = vpop.f32.mrb[7].mxu0 }
 0x10a   : > { %439 = vst.msk [vmem:[%s163_s17] sm:$0xff] %vm235_vm2, %v437_v40  ;;  %v438_v43 = vadd.f32 %v556_v36, %v429_v41 }
 0x10c   : > { %440 = vst.msk [vmem:[%s163_s17 + $0x8] sm:$0xff] %vm235_vm2, %v438_v43 }
 0x10d   : > { %685 = shalt.err (!%p682_p3)
}
 0x10e   : > { %s686_s4 = scalar_lea.hbm %s864_s26, 256  ;;  %s690_s7 = scalar_lea.hbm %s914_s3, 512 }
 0x10f   : > { %p687_p4 = scmp.ne.s32.totalorder %s864_s26, %s686_s4  ;;  %p691_p9 = scmp.lt.u32.totalorder %s864_s26, %s914_s3 }
 0x110   : > { %p692_p10 = scmp.lt.u32.totalorder %s690_s7, %s686_s4  ;;  %p694_p12 = scmp.lt.u32.totalorder %s686_s4, %s864_s26 }
 0x111   : > { %p688_p7 = pnand %p687_p4, %p799_p5 }
 0x112   : > { %p693_p11 = por %p692_p10, %p691_p9 }
 0x113   : > { %p689_p8 = pneg %p688_p7 }
 0x114   : > { %p695_p13 = por %p694_p12, %p693_p11 }
 0x116   : > { %p696_p0 = pnand %p695_p13, %p689_p8 }
 0x118   : > { %699 = shalt.err (!%p696_p0)
}
 0x119   : > { %s739_s10 = smov 128   ;;  %s740_s11 = smov 8  }
 0x11a   : > { %615 = dma.vmem_to_hbm [thread:$0]  (%p799_p5), %s866_s19, 256, %s864_s26, %s870_s16, %s739_s10, %s739_s10, %s740_s11  }
 0x11b PF: > { %p621_p1 = scmp.ge.s32.totalorder %s734_s15, 2  ;;  %s470_s17 = sand.u32 1, %s722_s12  }
 0x11c   : > { %s471_s20 = scalar_lea.sflag [#allocation3], %s470_s17 }
 0x11d   : > { %p618_p2 = pnand %p621_p1, %p803_p6 }
 0x11f   : > { %717 = dma.done.wait (!%p618_p2), %s471_s20, 256  }
 0x120   : > { %719 = vsyncadd (!%p618_p2), %s471_s20, 4294967040  ;;  %p13_p3 = scmp.ge.s32.totalorder %s786_s18, 4   ;;  %s917_s12 = smov %s726_s13 }
 0x121   : > { %s918_s13 = smov %s730_s14  ;;  %s919_s14 = smov %s797_s21 }
 0x122   : > { %s920_s15 = smov %s786_s18  ;;  %15 = sbr.rel (!%p13_p3) target bundleno = 3 (0x3), region = 69 }
 0x129   :  { %476 = vsyncpa [#allocation3], 1 }
 0x12a   :  { %478 = vsyncpa [#allocation3 + $0x1], 1 }

// kernel: inception_self_atten.8
= control target key start
LH: loop header
LB: loop body
LE: loop exit
PB: predicated region body
PF: predicated region fallthrough
CT: control target
= control target key end

     0   :  { %v1557_v1 = vmov 0.0   ;;  %vm76_vm0 = vcmask 130048   ;;  %vm1558_vm1 = vmmov 0   ;;  %s1983_s0 = inlined_call_operand.vmem [shape: bf16[8,16,16], index: 0, kind: input, shape index: {}]   ;;  %s1984_s1 = inlined_call_operand.vmem [shape: bf16[8,16,16], index: 1, kind: input, shape index: {}]   ;;  %s1985_s2 = inlined_call_operand.vmem [shape: bf16[8,16,16], index: 2, kind: input, shape index: {}]   ;;  %s1986_s3 = inlined_call_operand.vmem [shape: bf16[8,16,16], index: 3, kind: output, shape index: {0}]   ;;  %s1987_s4 = inlined_call_operand.hbm [shape: f32[8,16,16], index: 4, kind: output, shape index: {1}]  }
   0x1   :  { %v1445_v0 = vld [vmem:[%s1984_s1] sm:$0xff]   ;;  %1344 = vmatprep.subr.bf16.mxu0 %v1557_v1  ;;  %1350 = vmatprep.subr.bf16.mxu1 %v1557_v1  ;;  %v1446_v2 = vld [vmem:[%s1984_s1 + $0x8] sm:$0xff]   ;;  %v1449_v6 = vld [vmem:[%s1984_s1 + $0x10] sm:$0xff]  }
   0x2   :  { %v81_v3 = vsel %vm76_vm0, %v1445_v0, 0  ;;  %v138_v4 = vsel %vm76_vm0, %v1446_v2, 0  ;;  %1346 = vmatprep.mubr.msk.bf16.mxu0 %vm1558_vm1, %v1557_v1  ;;  %1352 = vmatprep.mubr.msk.bf16.mxu1 %vm1558_vm1, %v1557_v1  ;;  %v1447_v5 = vld [vmem:[%s1983_s0] sm:$0xff]   ;;  %v1450_v7 = vld [vmem:[%s1984_s1 + $0x18] sm:$0xff]   ;;  %v1448_v8 = vld [vmem:[%s1983_s0 + $0x8] sm:$0xff]   ;;  %v195_v9 = vsel %vm76_vm0, %v1449_v6, 0 }
   0x3   :  { %1345 = vmatpush3.bf16.xpose.msra.mxu0 %v81_v3  ;;  %1351 = vmatpush3.bf16.xpose.msra.mxu1 %v138_v4  ;;  %v252_v10 = vsel %vm76_vm0, %v1450_v7, 0  ;;  %v1452_v11 = vld [vmem:[%s1984_s1 + $0x20] sm:$0xff]   ;;  %v1454_v12 = vld [vmem:[%s1984_s1 + $0x28] sm:$0xff]   ;;  %v1451_v13 = vld [vmem:[%s1983_s0 + $0x10] sm:$0xff]  }
   0x4   :  { %1356 = vmatprep.subr.bf16.mxu0 %v1557_v1  ;;  %1362 = vmatprep.subr.bf16.mxu1 %v1557_v1  ;;  %v1453_v14 = vld [vmem:[%s1983_s0 + $0x18] sm:$0xff]   ;;  %v309_v15 = vsel %vm76_vm0, %v1452_v11, 0  ;;  %v366_v16 = vsel %vm76_vm0, %v1454_v12, 0  ;;  %v1456_v17 = vld [vmem:[%s1984_s1 + $0x30] sm:$0xff]  }
   0x5   :  { %v1458_v18 = vld [vmem:[%s1984_s1 + $0x38] sm:$0xff]  }
   0xa   :  { %1347 = vmatmul.mubr.msk.bf16.vlgmr.msra.gmra.mrb[0].mxu0 %vm76_vm0, %v1447_v5  ;;  %1353 = vmatmul.mubr.msk.bf16.vlgmr.msra.gmra.mrb[0].mxu1 %vm76_vm0, %v1448_v8 }
   0xb   :  { %1357 = vmatpush3.bf16.xpose.msra.mxu0 %v195_v9  ;;  %1363 = vmatpush3.bf16.xpose.msra.mxu1 %v252_v10 }
   0xc   :  { %1358 = vmatprep.mubr.msk.bf16.mxu0 %vm1558_vm1, %v1557_v1  ;;  %1368 = vmatprep.subr.bf16.mxu0 %v1557_v1 }
   0xd   :  { %1364 = vmatprep.mubr.msk.bf16.mxu1 %vm1558_vm1, %v1557_v1  ;;  %1374 = vmatprep.subr.bf16.mxu1 %v1557_v1 }
  0x12   :  { %1359 = vmatmul.mubr.msk.bf16.vlgmr.msra.gmra.mrb[4].mxu0 %vm76_vm0, %v1451_v13  ;;  %1365 = vmatmul.mubr.msk.bf16.vlgmr.msra.gmra.mrb[4].mxu1 %vm76_vm0, %v1453_v14 }
  0x13   :  { %1369 = vmatpush3.bf16.xpose.msra.mxu0 %v309_v15  ;;  %1375 = vmatpush3.bf16.xpose.msra.mxu1 %v366_v16 }
  0x14   :  { %1370 = vmatprep.mubr.msk.bf16.mxu0 %vm1558_vm1, %v1557_v1  ;;  %1380 = vmatprep.subr.bf16.mxu0 %v1557_v1 }
  0x15   :  { %1376 = vmatprep.mubr.msk.bf16.mxu1 %vm1558_vm1, %v1557_v1 }
  0x16   :  { %10 = vsyncpa [#allocation3], 0  ;;  %v1455_v19 = vld [vmem:[%s1983_s0 + $0x20] sm:$0xff]   ;;  %1386 = vmatprep.subr.bf16.mxu1 %v1557_v1  ;;  %v1457_v20 = vld [vmem:[%s1983_s0 + $0x28] sm:$0xff]   ;;  %v423_v21 = vsel %vm76_vm0, %v1456_v17, 0  ;;  %v480_v22 = vsel %vm76_vm0, %v1458_v18, 0 }
  0x17   :  { %v1459_v23 = vld [vmem:[%s1983_s0 + $0x30] sm:$0xff]   ;;  %v1460_v24 = vld [vmem:[%s1983_s0 + $0x38] sm:$0xff]  }
  0x1a   :  { %1371 = vmatmul.mubr.msk.bf16.vlgmr.msra.gmra.mrb[8].mxu0 %vm76_vm0, %v1455_v19  ;;  %1377 = vmatmul.mubr.msk.bf16.vlgmr.msra.gmra.mrb[8].mxu1 %vm76_vm0, %v1457_v20 }
  0x1b   :  { %1381 = vmatpush3.bf16.xpose.msra.mxu0 %v423_v21  ;;  %1387 = vmatpush3.bf16.xpose.msra.mxu1 %v480_v22 }
  0x1c   :  { %1382 = vmatprep.mubr.msk.bf16.mxu0 %vm1558_vm1, %v1557_v1  ;;  %1388 = vmatprep.mubr.msk.bf16.mxu1 %vm1558_vm1, %v1557_v1 }
  0x1d   :  { %1392 = vmatprep.subr.bf16.mxu0 %v1557_v1  ;;  %1398 = vmatprep.subr.bf16.mxu1 %v1557_v1 }
  0x22   :  { %1383 = vmatmul.mubr.msk.bf16.vlgmr.msra.gmra.mrb[12].mxu0 %vm76_vm0, %v1459_v23  ;;  %1389 = vmatmul.mubr.msk.bf16.vlgmr.msra.gmra.mrb[12].mxu1 %vm76_vm0, %v1460_v24 }
  0x23   :  { %1394 = vmatprep.mubr.msk.bf16.mxu0 %vm1558_vm1, %v1557_v1  ;;  %1400 = vmatprep.mubr.msk.bf16.mxu1 %vm1558_vm1, %v1557_v1 }
  0xdd   :  { %v117_v25 = vpop.f32.mrb[0].mxu0  ;;  %v174_v27 = vpop.f32.mrb[0].mxu1 }
  0xde   :  { %v1681_v26 = vmul.f32 0.25, %v117_v25  ;;  %v1348_v28 = vpop.f32.mrb[1].mxu0  ;;  %v1683_v29 = vmul.f32 0.25, %v174_v27  ;;  %v1354_v31 = vpop.f32.mrb[1].mxu1 }
  0xdf   :  { %v120_v30 = vpop.f32.mrb[2].mxu0  ;;  %v177_v34 = vpop.f32.mrb[2].mxu1 }
  0xe0   :  { %v1685_v32 = vmul.f32 0.25, %v120_v30  ;;  %v1349_v33 = vpop.f32.mrb[3].mxu0  ;;  %v539_v35 = vsel %vm76_vm0, %v1681_v26, -inf  ;;  %v1689_v36 = vmul.f32 0.25, %v177_v34  ;;  %v545_v37 = vsel %vm76_vm0, %v1683_v29, -inf  ;;  %v1355_v38 = vpop.f32.mrb[3].mxu1 }
  0xe1   :  { %540 = vmax.xlane.f32.xlu0 %v539_v35  ;;  %546 = vmax.xlane.f32.xlu1 %v545_v37 }
  0xe2   :  { %v548_v39 = vsel %vm76_vm0, %v1689_v36, -inf  ;;  %v542_v40 = vsel %vm76_vm0, %v1685_v32, -inf }
  0xe5   :  { %543 = vmax.xlane.f32.xlu0 %v542_v40  ;;  %v231_v41 = vpop.f32.mrb[4].mxu0  ;;  %549 = vmax.xlane.f32.xlu1 %v548_v39  ;;  %v288_v44 = vpop.f32.mrb[4].mxu1 }
  0xe6   :  { %v1697_v42 = vmul.f32 0.25, %v231_v41  ;;  %v1360_v43 = vpop.f32.mrb[5].mxu0  ;;  %v1699_v46 = vmul.f32 0.25, %v288_v44  ;;  %v1366_v47 = vpop.f32.mrb[5].mxu1 }
  0xe7   :  { %v234_v45 = vpop.f32.mrb[6].mxu0  ;;  %v291_v51 = vpop.f32.mrb[6].mxu1 }
  0xe8   :  { %v1701_v48 = vmul.f32 0.25, %v234_v45  ;;  %v1361_v49 = vpop.f32.mrb[7].mxu0  ;;  %v551_v50 = vsel %vm76_vm0, %v1697_v42, -inf  ;;  %v1705_v52 = vmul.f32 0.25, %v291_v51  ;;  %v1367_v53 = vpop.f32.mrb[7].mxu1  ;;  %v557_v55 = vsel %vm76_vm0, %v1699_v46, -inf }
  0xe9   :  { %552 = vmax.xlane.f32.xlu0 %v551_v50 }
  0xea   :  { %v554_v54 = vsel %vm76_vm0, %v1701_v48, -inf  ;;  %v560_v56 = vsel %vm76_vm0, %v1705_v52, -inf }
  0xeb   :  { %555 = vmax.xlane.f32.xlu1 %v554_v54 }
  0xed   :  { %558 = vmax.xlane.f32.xlu0 %v557_v55  ;;  %v345_v57 = vpop.f32.mrb[8].mxu0  ;;  %v402_v60 = vpop.f32.mrb[8].mxu1 }
  0xee   :  { %v1713_v58 = vmul.f32 0.25, %v345_v57  ;;  %v1372_v59 = vpop.f32.mrb[9].mxu0  ;;  %v1715_v62 = vmul.f32 0.25, %v402_v60  ;;  %v1378_v63 = vpop.f32.mrb[9].mxu1 }
  0xef   :  { %561 = vmax.xlane.f32.xlu1 %v560_v56  ;;  %v348_v61 = vpop.f32.mrb[10].mxu0  ;;  %v405_v4 = vpop.f32.mrb[10].mxu1 }
  0xf0   :  { %v1717_v0 = vmul.f32 0.25, %v348_v61  ;;  %v1373_v2 = vpop.f32.mrb[11].mxu0  ;;  %v563_v3 = vsel %vm76_vm0, %v1713_v58, -inf  ;;  %v1721_v5 = vmul.f32 0.25, %v405_v4  ;;  %v1379_v6 = vpop.f32.mrb[11].mxu1  ;;  %v569_v8 = vsel %vm76_vm0, %v1715_v62, -inf }
  0xf1   :  { %564 = vmax.xlane.f32.xlu0 %v563_v3 }
  0xf2   :  { %v566_v7 = vsel %vm76_vm0, %v1717_v0, -inf  ;;  %v572_v9 = vsel %vm76_vm0, %v1721_v5, -inf }
  0xf3   :  { %567 = vmax.xlane.f32.xlu1 %v566_v7 }
  0xf5   :  { %570 = vmax.xlane.f32.xlu0 %v569_v8  ;;  %v459_v10 = vpop.f32.mrb[12].mxu0  ;;  %v516_v13 = vpop.f32.mrb[12].mxu1 }
  0xf6   :  { %v1729_v11 = vmul.f32 0.25, %v459_v10  ;;  %v1384_v12 = vpop.f32.mrb[13].mxu0  ;;  %v1731_v15 = vmul.f32 0.25, %v516_v13  ;;  %v1390_v16 = vpop.f32.mrb[13].mxu1 }
  0xf7   :  { %573 = vmax.xlane.f32.xlu1 %v572_v9  ;;  %v462_v14 = vpop.f32.mrb[14].mxu0  ;;  %v519_v20 = vpop.f32.mrb[14].mxu1 }
  0xf8   :  { %v1733_v17 = vmul.f32 0.25, %v462_v14  ;;  %v1385_v18 = vpop.f32.mrb[15].mxu0  ;;  %v575_v19 = vsel %vm76_vm0, %v1729_v11, -inf  ;;  %v1737_v21 = vmul.f32 0.25, %v519_v20  ;;  %v1391_v22 = vpop.f32.mrb[15].mxu1  ;;  %v581_v24 = vsel %vm76_vm0, %v1731_v15, -inf }
  0xf9   :  { %576 = vmax.xlane.f32.xlu0 %v575_v19 }
  0xfa   :  { %v578_v23 = vsel %vm76_vm0, %v1733_v17, -inf  ;;  %v584_v25 = vsel %vm76_vm0, %v1737_v21, -inf }
  0xfb   :  { %579 = vmax.xlane.f32.xlu1 %v578_v23 }
  0xfd   :  { %582 = vmax.xlane.f32.xlu0 %v581_v24 }
  0xff   :  { %585 = vmax.xlane.f32.xlu1 %v584_v25 }
 0x16e   :  { %v541_v27 = vpop.xlane.xlu0 %540  ;;  %v547_v28 = vpop.xlane.xlu1 %546 }
 0x16f   :  { %v587_v30 = vsub.f32 %v1681_v26, %v541_v27  ;;  %v589_v31 = vsub.f32 %v1683_v29, %v547_v28 }
 0x171   :  { %v603_v33 = vmul.f32 1.442695, %v587_v30  ;;  %v607_v34 = vmul.f32 1.442695, %v589_v31 }
 0x172   :  { %v544_v35 = vpop.xlane.xlu0 %543  ;;  %v550_v37 = vpop.xlane.xlu1 %549 }
 0x173   :  { %1469 = vpow2.f32 %v603_v33  ;;  %v588_v38 = vsub.f32 %v1685_v32, %v544_v35  ;;  %v590_v39 = vsub.f32 %v1689_v36, %v550_v37 }
 0x174   :  { %1471 = vpow2.f32 %v607_v34 }
 0x175   :  { %v605_v40 = vmul.f32 1.442695, %v588_v38  ;;  %v609_v41 = vmul.f32 1.442695, %v590_v39 }
 0x176   :  { %v553_v43 = vpop.xlane.xlu0 %552 }
 0x177   :  { %1473 = vpow2.f32 %v605_v40  ;;  %v591_v44 = vsub.f32 %v1697_v42, %v553_v43 }
 0x178   :  { %v556_v45 = vpop.xlane.xlu1 %555  ;;  %1475 = vpow2.f32 %v609_v41 }
 0x179   :  { %v611_v26 = vmul.f32 1.442695, %v591_v44  ;;  %v592_v29 = vsub.f32 %v1701_v48, %v556_v45 }
 0x17a   :  { %v559_v47 = vpop.xlane.xlu0 %558 }
 0x17b   :  { %1477 = vpow2.f32 %v611_v26  ;;  %v613_v49 = vmul.f32 1.442695, %v592_v29  ;;  %v593_v50 = vsub.f32 %v1699_v46, %v559_v47  ;;  %v1461_v29 = vld [vmem:[%s1985_s2] sm:$0xff]  }
 0x17c   :  { %v562_v32 = vpop.xlane.xlu1 %561  ;;  %1393 = vmatpush3.bf16.msra.mxu0 %v1461_v29 }
 0x17d   :  { %v1752_v51 = vpop.eup %1469  ;;  %1479 = vpow2.f32 %v613_v49  ;;  %v615_v36 = vmul.f32 1.442695, %v593_v50  ;;  %v594_v53 = vsub.f32 %v1705_v52, %v562_v32  ;;  %1404 = vmatprep.subr.bf16.mxu0 %v1557_v1  ;;  %v1462_v49 = vld [vmem:[%s1985_s2 + $0x8] sm:$0xff]  }
 0x17e   :  { %v565_v54 = vpop.xlane.xlu0 %564  ;;  %v635_v42 = vsel %vm76_vm0, %v1752_v51, 0.0  ;;  %v1757_v55 = vpop.eup %1471  ;;  %1399 = vmatpush3.bf16.msra.mxu1 %v1462_v49 }
 0x17f   :  { %1481 = vpow2.f32 %v615_v36  ;;  %v617_v48 = vmul.f32 1.442695, %v594_v53  ;;  %v595_v56 = vsub.f32 %v1713_v58, %v565_v54  ;;  %636 = vadd.xlane.f32.xlu0 %v635_v42  ;;  %v641_v52 = vsel %vm76_vm0, %v1757_v55, 0.0  ;;  %1410 = vmatprep.subr.bf16.mxu1 %v1557_v1 }
 0x180   :  { %v568_v57 = vpop.xlane.xlu1 %567 }
 0x181   :  { %v1760_v46 = vpop.eup %1473  ;;  %1483 = vpow2.f32 %v617_v48  ;;  %v619_v59 = vmul.f32 1.442695, %v595_v56  ;;  %v596_v60 = vsub.f32 %v1717_v0, %v568_v57 }
 0x182   :  { %v571_v61 = vpop.xlane.xlu0 %570  ;;  %v638_v63 = vsel %vm76_vm0, %v1760_v46, 0.0  ;;  %v1767_v2 = vpop.eup %1475 }
 0x183   :  { %1485 = vpow2.f32 %v619_v59  ;;  %v621_v3 = vmul.f32 1.442695, %v596_v60  ;;  %v597_v58 = vsub.f32 %v1715_v62, %v571_v61  ;;  %642 = vadd.xlane.f32.xlu0 %v641_v52  ;;  %639 = vadd.xlane.f32.xlu1 %v638_v63  ;;  %v644_v10 = vsel %vm76_vm0, %v1767_v2, 0.0 }
 0x184   :  { %v574_v4 = vpop.xlane.xlu1 %573 }
 0x185   :  { %v1770_v6 = vpop.eup %1477  ;;  %1487 = vpow2.f32 %v621_v3  ;;  %v623_v0 = vmul.f32 1.442695, %v597_v58  ;;  %v598_v7 = vsub.f32 %v1721_v5, %v574_v4 }
 0x186   :  { %v577_v8 = vpop.xlane.xlu0 %576  ;;  %v647_v9 = vsel %vm76_vm0, %v1770_v6, 0.0 }
 0x187   :  { %v1777_v12 = vpop.eup %1479  ;;  %1489 = vpow2.f32 %v623_v0  ;;  %v625_v62 = vmul.f32 1.442695, %v598_v7  ;;  %v599_v13 = vsub.f32 %v1729_v11, %v577_v8  ;;  %648 = vadd.xlane.f32.xlu0 %v647_v9  ;;  %645 = vadd.xlane.f32.xlu1 %v644_v10 }
 0x188   :  { %v580_v14 = vpop.xlane.xlu1 %579  ;;  %v650_v22 = vsel %vm76_vm0, %v1777_v12, 0.0 }
 0x189   :  { %v1780_v16 = vpop.eup %1481  ;;  %1491 = vpow2.f32 %v625_v62  ;;  %v627_v5 = vmul.f32 1.442695, %v599_v13  ;;  %v600_v18 = vsub.f32 %v1733_v17, %v580_v14 }
 0x18a   :  { %v583_v19 = vpop.xlane.xlu0 %582  ;;  %v653_v20 = vsel %vm76_vm0, %v1780_v16, 0.0 }
 0x18b   :  { %v1787_v23 = vpop.eup %1483  ;;  %1493 = vpow2.f32 %v627_v5  ;;  %v629_v11 = vmul.f32 1.442695, %v600_v18  ;;  %v601_v24 = vsub.f32 %v1731_v15, %v583_v19  ;;  %654 = vadd.xlane.f32.xlu0 %v653_v20  ;;  %651 = vadd.xlane.f32.xlu1 %v650_v22  ;;  %v1465_v18 = vld [vmem:[%s1985_s2 + $0x20] sm:$0xff]  }
 0x18c   :  { %v586_v25 = vpop.xlane.xlu1 %585  ;;  %v656_v31 = vsel %vm76_vm0, %v1787_v23, 0.0 }
 0x18d   :  { %v1790_v27 = vpop.eup %1485  ;;  %1495 = vpow2.f32 %v629_v11  ;;  %v631_v17 = vmul.f32 1.442695, %v601_v24  ;;  %v602_v28 = vsub.f32 %v1737_v21, %v586_v25  ;;  %v1466_v25 = vld [vmem:[%s1985_s2 + $0x28] sm:$0xff]  }
 0x18e   :  { %v659_v30 = vsel %vm76_vm0, %v1790_v27, 0.0 }
 0x18f   :  { %v1797_v33 = vpop.eup %1487  ;;  %1497 = vpow2.f32 %v631_v17  ;;  %v633_v34 = vmul.f32 1.442695, %v602_v28  ;;  %660 = vadd.xlane.f32.xlu0 %v659_v30  ;;  %657 = vadd.xlane.f32.xlu1 %v656_v31 }
 0x190   :  { %v662_v21 = vsel %vm76_vm0, %v1797_v33, 0.0 }
 0x191   :  { %v1799_v15 = vpop.eup %1489  ;;  %1499 = vpow2.f32 %v633_v34  ;;  %v1467_v34 = vld [vmem:[%s1985_s2 + $0x30] sm:$0xff]  }
 0x192   :  { %v665_v35 = vsel %vm76_vm0, %v1799_v15, 0.0 }
 0x193   :  { %v1805_v37 = vpop.eup %1491  ;;  %666 = vadd.xlane.f32.xlu0 %v665_v35  ;;  %663 = vadd.xlane.f32.xlu1 %v662_v21 }
 0x194   :  { %v668_v40 = vsel %vm76_vm0, %v1805_v37, 0.0 }
 0x195   :  { %v1807_v38 = vpop.eup %1493 }
 0x196   :  { %v671_v39 = vsel %vm76_vm0, %v1807_v38, 0.0 }
 0x197   :  { %v1813_v41 = vpop.eup %1495  ;;  %672 = vadd.xlane.f32.xlu0 %v671_v39  ;;  %669 = vadd.xlane.f32.xlu1 %v668_v40  ;;  %v1468_v40 = vld [vmem:[%s1985_s2 + $0x38] sm:$0xff]  }
 0x198   :  { %v674_v45 = vsel %vm76_vm0, %v1813_v41, 0.0 }
 0x199   :  { %v1815_v43 = vpop.eup %1497 }
 0x19a   :  { %v677_v44 = vsel %vm76_vm0, %v1815_v43, 0.0 }
 0x19b   :  { %v1821_v26 = vpop.eup %1499  ;;  %678 = vadd.xlane.f32.xlu0 %v677_v44  ;;  %675 = vadd.xlane.f32.xlu1 %v674_v45 }
 0x19c   :  { %v680_v47 = vsel %vm76_vm0, %v1821_v26, 0.0 }
 0x19f   :  { %681 = vadd.xlane.f32.xlu1 %v680_v47 }
 0x20c   :  { %v637_v50 = vpop.xlane.xlu0 %636 }
 0x20d   :  { %1501 = vrcp.f32 %v637_v50 }
 0x210   :  { %v643_v32 = vpop.xlane.xlu0 %642  ;;  %v640_v36 = vpop.xlane.xlu1 %639 }
 0x211   :  { %1503 = vrcp.f32 %v643_v32 }
 0x212   :  { %1505 = vrcp.f32 %v640_v36 }
 0x214   :  { %v649_v53 = vpop.xlane.xlu0 %648  ;;  %v646_v54 = vpop.xlane.xlu1 %645 }
 0x215   :  { %1507 = vrcp.f32 %v649_v53 }
 0x216   :  { %1509 = vrcp.f32 %v646_v54 }
 0x217   :  { %v1502_v42 = vpop.eup %1501 }
 0x218   :  { %v699_v48 = vmul.f32 %v1502_v42, %v1752_v51  ;;  %v655_v56 = vpop.xlane.xlu0 %654  ;;  %v652_v57 = vpop.xlane.xlu1 %651  ;;  %v1463_v51 = vld [vmem:[%s1985_s2 + $0x10] sm:$0xff]  }
 0x219   :  { %1511 = vrcp.f32 %v655_v56 }
 0x21a   :  { %1204 = vst.msk [vmem:[#allocation2] sm:$0xff] %vm76_vm0, %v699_v48  ;;  %1513 = vrcp.f32 %v652_v57 }
 0x21b   :  { %v1504_v59 = vpop.eup %1503 }
 0x21c   :  { %v1506_v60 = vpop.eup %1505  ;;  %v701_v61 = vmul.f32 %v1504_v59, %v1757_v55  ;;  %v661_v52 = vpop.xlane.xlu0 %660 }
 0x21d   :  { %v658_v63 = vpop.xlane.xlu1 %657  ;;  %v700_v3 = vmul.f32 %v1506_v60, %v1760_v46  ;;  %1515 = vrcp.f32 %v661_v52  ;;  %v1464_v46 = vld [vmem:[%s1985_s2 + $0x18] sm:$0xff]   ;;  %s1559_s2 = smov [#allocation2]  }
 0x21e   :  { %1206 = vst.msk [vmem:[#allocation2 + $0x10] sm:$0xff] %vm76_vm0, %v701_v61  ;;  %1517 = vrcp.f32 %v658_v63  ;;  %s1227_s9 = sshll.u32 %s1559_s2, 4  ;;  %s1228_s9 = int_to_ptr.vmem [resolvable:$true] %s1227_s9 }
 0x21f   :  { %v1508_v58 = vpop.eup %1507  ;;  %1205 = vst.msk [vmem:[#allocation2 + $0x8] sm:$0xff] %vm76_vm0, %v700_v3  ;;  %v715_v4 = vpack.c.bf16 %v700_v3, %v699_v48  ;;  %s1533_s10 = scalar_lea.vmem %s1228_s9, 2048  ;;  %p1538_p1 = scmp.lt.s32.totalorder %s1228_s9, %s1228_s9 }
 0x220   :  { %v1510_v0 = vpop.eup %1509  ;;  %v703_v7 = vmul.f32 %v1508_v58, %v1770_v6  ;;  %v667_v55 = vpop.xlane.xlu0 %666  ;;  %p1534_p0 = scmp.ne.s32.totalorder %s1228_s9, %s1533_s10  ;;  %p1539_p2 = scmp.lt.s32.totalorder %s1533_s10, %s1533_s10 }
 0x221   :  { %v664_v8 = vpop.xlane.xlu1 %663  ;;  %v702_v9 = vmul.f32 %v1510_v0, %v1767_v2  ;;  %1519 = vrcp.f32 %v667_v55  ;;  %1395 = vmatmul.mubr.msk.bf16.vlgmr.msra.gmra.mrb[16].mxu0 %vm76_vm0, %v715_v4 }
 0x222   :  { %1208 = vst.msk [vmem:[#allocation2 + $0x20] sm:$0xff] %vm76_vm0, %v703_v7  ;;  %1521 = vrcp.f32 %v664_v8  ;;  %1405 = vmatpush3.bf16.msra.mxu0 %v1463_v51  ;;  %1406 = vmatprep.mubr.msk.bf16.mxu0 %vm1558_vm1, %v1557_v1  ;;  %p1540_p3 = por %p1539_p2, %p1538_p1 }
 0x223   :  { %v1512_v10 = vpop.eup %1511  ;;  %1207 = vst.msk [vmem:[#allocation2 + $0x18] sm:$0xff] %vm76_vm0, %v702_v9  ;;  %v716_v6 = vpack.c.bf16 %v702_v9, %v701_v61  ;;  %1416 = vmatprep.subr.bf16.mxu0 %v1557_v1 }
 0x224   :  { %v1514_v2 = vpop.eup %1513  ;;  %v705_v62 = vmul.f32 %v1512_v10, %v1780_v16  ;;  %v673_v13 = vpop.xlane.xlu0 %672  ;;  %p1541_p4 = pnand %p1540_p3, %p1534_p0 }
 0x225   :  { %v670_v14 = vpop.xlane.xlu1 %669  ;;  %v704_v5 = vmul.f32 %v1514_v2, %v1777_v12  ;;  %1523 = vrcp.f32 %v673_v13  ;;  %1401 = vmatmul.mubr.msk.bf16.vlgmr.msra.gmra.mrb[16].mxu1 %vm76_vm0, %v716_v6 }
 0x226   :  { %1210 = vst.msk [vmem:[#allocation2 + $0x30] sm:$0xff] %vm76_vm0, %v705_v62  ;;  %1411 = vmatpush3.bf16.msra.mxu1 %v1464_v46  ;;  %1525 = vrcp.f32 %v670_v14  ;;  %1412 = vmatprep.mubr.msk.bf16.mxu1 %vm1558_vm1, %v1557_v1 }
 0x227   :  { %v1516_v19 = vpop.eup %1515  ;;  %1209 = vst.msk [vmem:[#allocation2 + $0x28] sm:$0xff] %vm76_vm0, %v704_v5  ;;  %v717_v16 = vpack.c.bf16 %v704_v5, %v703_v7  ;;  %1422 = vmatprep.subr.bf16.mxu1 %v1557_v1 }
 0x228   :  { %v1518_v12 = vpop.eup %1517  ;;  %v707_v20 = vmul.f32 %v1516_v19, %v1790_v27  ;;  %v679_v22 = vpop.xlane.xlu0 %678 }
 0x229   :  { %v676_v11 = vpop.xlane.xlu1 %675  ;;  %v706_v24 = vmul.f32 %v1518_v12, %v1787_v23  ;;  %1527 = vrcp.f32 %v679_v22  ;;  %1407 = vmatmul.mubr.msk.bf16.vlgmr.msra.gmra.mrb[20].mxu0 %vm76_vm0, %v717_v16 }
 0x22a   :  { %1212 = vst.msk [vmem:[#allocation2 + $0x40] sm:$0xff] %vm76_vm0, %v707_v20  ;;  %1529 = vrcp.f32 %v676_v11  ;;  %1417 = vmatpush3.bf16.msra.mxu0 %v1465_v18  ;;  %1418 = vmatprep.mubr.msk.bf16.mxu0 %vm1558_vm1, %v1557_v1 }
 0x22b   :  { %v1520_v17 = vpop.eup %1519  ;;  %1211 = vst.msk [vmem:[#allocation2 + $0x38] sm:$0xff] %vm76_vm0, %v706_v24  ;;  %v718_v27 = vpack.c.bf16 %v706_v24, %v705_v62  ;;  %1428 = vmatprep.subr.bf16.mxu0 %v1557_v1 }
 0x22c   :  { %v1522_v23 = vpop.eup %1521  ;;  %v709_v28 = vmul.f32 %v1520_v17, %v1799_v15 }
 0x22d   :  { %v682_v30 = vpop.xlane.xlu1 %681  ;;  %v708_v31 = vmul.f32 %v1522_v23, %v1797_v33  ;;  %1413 = vmatmul.mubr.msk.bf16.vlgmr.msra.gmra.mrb[20].mxu1 %vm76_vm0, %v718_v27 }
 0x22e   :  { %1531 = vrcp.f32 %v682_v30  ;;  %1214 = vst.msk [vmem:[#allocation2 + $0x50] sm:$0xff] %vm76_vm0, %v709_v28  ;;  %1423 = vmatpush3.bf16.msra.mxu1 %v1466_v25  ;;  %1424 = vmatprep.mubr.msk.bf16.mxu1 %vm1558_vm1, %v1557_v1 }
 0x22f   :  { %v1524_v35 = vpop.eup %1523  ;;  %1213 = vst.msk [vmem:[#allocation2 + $0x48] sm:$0xff] %vm76_vm0, %v708_v31  ;;  %v719_v15 = vpack.c.bf16 %v708_v31, %v707_v20  ;;  %1434 = vmatprep.subr.bf16.mxu1 %v1557_v1 }
 0x230   :  { %v1526_v33 = vpop.eup %1525  ;;  %v711_v21 = vmul.f32 %v1524_v35, %v1807_v38 }
 0x231   :  { %v710_v39 = vmul.f32 %v1526_v33, %v1805_v37  ;;  %1419 = vmatmul.mubr.msk.bf16.vlgmr.msra.gmra.mrb[24].mxu0 %vm76_vm0, %v719_v15 }
 0x232   :  { %1216 = vst.msk [vmem:[#allocation2 + $0x60] sm:$0xff] %vm76_vm0, %v711_v21  ;;  %1429 = vmatpush3.bf16.msra.mxu0 %v1467_v34  ;;  %1430 = vmatprep.mubr.msk.bf16.mxu0 %vm1558_vm1, %v1557_v1 }
 0x233   :  { %v1528_v44 = vpop.eup %1527  ;;  %1215 = vst.msk [vmem:[#allocation2 + $0x58] sm:$0xff] %vm76_vm0, %v710_v39  ;;  %v720_v45 = vpack.c.bf16 %v710_v39, %v709_v28 }
 0x234   :  { %v1530_v29 = vpop.eup %1529  ;;  %v713_v38 = vmul.f32 %v1528_v44, %v1815_v43 }
 0x235   :  { %v712_v37 = vmul.f32 %v1530_v29, %v1813_v41  ;;  %1425 = vmatmul.mubr.msk.bf16.vlgmr.msra.gmra.mrb[24].mxu1 %vm76_vm0, %v720_v45 }
 0x236   :  { %1218 = vst.msk [vmem:[#allocation2 + $0x70] sm:$0xff] %vm76_vm0, %v713_v38  ;;  %1435 = vmatpush3.bf16.msra.mxu1 %v1468_v40  ;;  %1436 = vmatprep.mubr.msk.bf16.mxu1 %vm1558_vm1, %v1557_v1 }
 0x237   :  { %1217 = vst.msk [vmem:[#allocation2 + $0x68] sm:$0xff] %vm76_vm0, %v712_v37  ;;  %v721_v49 = vpack.c.bf16 %v712_v37, %v711_v21 }
 0x238   :  { %v1532_v47 = vpop.eup %1531 }
 0x239   :  { %v714_v50 = vmul.f32 %v1532_v47, %v1821_v26  ;;  %1431 = vmatmul.mubr.msk.bf16.vlgmr.msra.gmra.mrb[28].mxu0 %vm76_vm0, %v721_v49 }
 0x23b   :  { %1219 = vst.msk [vmem:[#allocation2 + $0x78] sm:$0xff] %vm76_vm0, %v714_v50  ;;  %v722_v43 = vpack.c.bf16 %v714_v50, %v713_v38 }
 0x23d   :  { %1437 = vmatmul.mubr.msk.bf16.vlgmr.msra.gmra.mrb[28].mxu1 %vm76_vm0, %v722_v43 }
 0x23e   :  { %1544 = shalt.err (!%p1541_p4)
}
 0x23f   :  { %s1545_s13 = scalar_lea.hbm %s1987_s4, 2048 }
 0x240   :  { %p1546_p5 = scmp.ne.s32.totalorder %s1987_s4, %s1545_s13  ;;  %p1549_p6 = scmp.lt.u32.totalorder %s1545_s13, %s1987_s4 }
 0x242   :  { %p1551_p7 = pnand %p1549_p6, %p1546_p5 }
 0x244   :  { %1554 = shalt.err (!%p1551_p7)
}
 0x245   :  { %s1560_s17 = smov 128   ;;  %s1561_s18 = smov 8   ;;  %vm1187_vm2 = vcmask 125952  }
 0x246   :  { %1233 = dma.vmem_to_hbm [thread:$0]  %s1228_s9, 2048, %s1987_s4, [#allocation3], %s1560_s17, %s1560_s17, %s1561_s18  }
 0x2f4   :  { %v766_v1 = vpop.f32.mrb[16].mxu0 }
 0x2f5   :  { %v1296_v41 = vpack.c.bf16 %v766_v1, %v766_v1  ;;  %v1396_v26 = vpop.f32.mrb[17].mxu0 }
 0x2f6   :  { %v769_v32 = vpop.f32.mrb[18].mxu0 }
 0x2f7   :  { %1188 = vst.msk [vmem:[%s1986_s3] sm:$0xf] %vm1187_vm2, %v1296_v41  ;;  %v1297_v36 = vpack.c.bf16 %v769_v32, %v769_v32  ;;  %v1397_v53 = vpop.f32.mrb[19].mxu0 }
 0x2f8   :  { %v816_v54 = vpop.f32.mrb[16].mxu1 }
 0x2f9   :  { %1189 = vst.msk [vmem:[%s1986_s3 + $0x4] sm:$0xf] %vm1187_vm2, %v1297_v36  ;;  %v1298_v42 = vpack.c.bf16 %v816_v54, %v816_v54  ;;  %v1402_v48 = vpop.f32.mrb[17].mxu1 }
 0x2fa   :  { %v819_v56 = vpop.f32.mrb[18].mxu1 }
 0x2fb   :  { %1190 = vst.msk [vmem:[%s1986_s3 + $0x8] sm:$0xf] %vm1187_vm2, %v1298_v42  ;;  %v1299_v57 = vpack.c.bf16 %v819_v56, %v819_v56  ;;  %v1403_v59 = vpop.f32.mrb[19].mxu1 }
 0x2fc   :  { %v866_v60 = vpop.f32.mrb[20].mxu0 }
 0x2fd   :  { %1191 = vst.msk [vmem:[%s1986_s3 + $0xc] sm:$0xf] %vm1187_vm2, %v1299_v57  ;;  %v1300_v61 = vpack.c.bf16 %v866_v60, %v866_v60  ;;  %v1408_v52 = vpop.f32.mrb[21].mxu0 }
 0x2fe   :  { %v869_v63 = vpop.f32.mrb[22].mxu0 }
 0x2ff   :  { %1192 = vst.msk [vmem:[%s1986_s3 + $0x10] sm:$0xf] %vm1187_vm2, %v1300_v61  ;;  %v1301_v3 = vpack.c.bf16 %v869_v63, %v869_v63  ;;  %v1409_v51 = vpop.f32.mrb[23].mxu0 }
 0x300   :  { %v916_v58 = vpop.f32.mrb[20].mxu1 }
 0x301   :  { %1193 = vst.msk [vmem:[%s1986_s3 + $0x14] sm:$0xf] %vm1187_vm2, %v1301_v3  ;;  %v1302_v4 = vpack.c.bf16 %v916_v58, %v916_v58  ;;  %v1414_v0 = vpop.f32.mrb[21].mxu1 }
 0x302   :  { %v919_v7 = vpop.f32.mrb[22].mxu1 }
 0x303   :  { %1194 = vst.msk [vmem:[%s1986_s3 + $0x18] sm:$0xf] %vm1187_vm2, %v1302_v4  ;;  %v1303_v55 = vpack.c.bf16 %v919_v7, %v919_v7  ;;  %v1415_v8 = vpop.f32.mrb[23].mxu1 }
 0x304   :  { %v966_v9 = vpop.f32.mrb[24].mxu0 }
 0x305   :  { %1195 = vst.msk [vmem:[%s1986_s3 + $0x1c] sm:$0xf] %vm1187_vm2, %v1303_v55  ;;  %v1304_v46 = vpack.c.bf16 %v966_v9, %v966_v9  ;;  %v1420_v10 = vpop.f32.mrb[25].mxu0 }
 0x306   :  { %v969_v6 = vpop.f32.mrb[26].mxu0 }
 0x307   :  { %1196 = vst.msk [vmem:[%s1986_s3 + $0x20] sm:$0xf] %vm1187_vm2, %v1304_v46  ;;  %v1305_v2 = vpack.c.bf16 %v969_v6, %v969_v6  ;;  %v1421_v62 = vpop.f32.mrb[27].mxu0 }
 0x308   :  { %v1016_v13 = vpop.f32.mrb[24].mxu1 }
 0x309   :  { %1197 = vst.msk [vmem:[%s1986_s3 + $0x24] sm:$0xf] %vm1187_vm2, %v1305_v2  ;;  %v1306_v14 = vpack.c.bf16 %v1016_v13, %v1016_v13  ;;  %v1426_v5 = vpop.f32.mrb[25].mxu1 }
 0x30a   :  { %v1019_v18 = vpop.f32.mrb[26].mxu1 }
 0x30b   :  { %1198 = vst.msk [vmem:[%s1986_s3 + $0x28] sm:$0xf] %vm1187_vm2, %v1306_v14  ;;  %v1307_v19 = vpack.c.bf16 %v1019_v18, %v1019_v18  ;;  %v1427_v16 = vpop.f32.mrb[27].mxu1 }
 0x30c   :  { %v1066_v12 = vpop.f32.mrb[28].mxu0 }
 0x30d   :  { %1199 = vst.msk [vmem:[%s1986_s3 + $0x2c] sm:$0xf] %vm1187_vm2, %v1307_v19  ;;  %v1308_v20 = vpack.c.bf16 %v1066_v12, %v1066_v12  ;;  %v1432_v22 = vpop.f32.mrb[29].mxu0 }
 0x30e   :  { %v1069_v11 = vpop.f32.mrb[30].mxu0 }
 0x30f   :  { %1200 = vst.msk [vmem:[%s1986_s3 + $0x30] sm:$0xf] %vm1187_vm2, %v1308_v20  ;;  %v1309_v24 = vpack.c.bf16 %v1069_v11, %v1069_v11  ;;  %v1433_v25 = vpop.f32.mrb[31].mxu0 }
 0x310   :  { %v1116_v17 = vpop.f32.mrb[28].mxu1 }
 0x311   :  { %1201 = vst.msk [vmem:[%s1986_s3 + $0x34] sm:$0xf] %vm1187_vm2, %v1309_v24  ;;  %v1310_v27 = vpack.c.bf16 %v1116_v17, %v1116_v17  ;;  %v1438_v23 = vpop.f32.mrb[29].mxu1 }
 0x312   :  { %v1119_v28 = vpop.f32.mrb[30].mxu1 }
 0x313   :  { %1202 = vst.msk [vmem:[%s1986_s3 + $0x38] sm:$0xf] %vm1187_vm2, %v1310_v27  ;;  %v1311_v30 = vpack.c.bf16 %v1119_v28, %v1119_v28  ;;  %v1439_v31 = vpop.f32.mrb[31].mxu1 }
 0x315   :  { %1203 = vst.msk [vmem:[%s1986_s3 + $0x3c] sm:$0xf] %vm1187_vm2, %v1311_v30 }
 0x316   :  { %1555 = dma.done.wait [#allocation3], 2048  }
 0x317   :  { %1556 = vsyncadd [#allocation3], 4294965248 }
 0x318   :  { %1239 = vsyncpa [#allocation3], 1 }

// kernel: inception_self_atten.7
= control target key start
LH: loop header
LB: loop body
LE: loop exit
PB: predicated region body
PF: predicated region fallthrough
CT: control target
= control target key end

     0   :  { %s3820_s30 = smov 0   ;;  %s4413_s0 = inlined_call_operand.vmem [shape: f32[2,54,4], index: 0, kind: input, shape index: {}]   ;;  %s4414_s1 = inlined_call_operand.vmem [shape: bf16[4,16], index: 1, kind: input, shape index: {}]   ;;  %s4415_s2 = inlined_call_operand.vmem [shape: bf16[4,16], index: 2, kind: input, shape index: {}]   ;;  %s4416_s3 = inlined_call_operand.vmem [shape: bf16[39,16,48], index: 3, kind: input, shape index: {}]   ;;  %s4417_s4 = inlined_call_operand.vmem [shape: f32[1,48], index: 4, kind: input, shape index: {}]   ;;  %s4418_s5 = inlined_call_operand.vmem [shape: f32[1,48], index: 5, kind: input, shape index: {}]   ;;  %s4419_s6 = inlined_call_operand.vmem [shape: f32[1,16], index: 6, kind: input, shape index: {}]   ;;  %s4420_s7 = inlined_call_operand.vmem [shape: f32[1,16], index: 7, kind: input, shape index: {}]   ;;  %s4421_s8 = inlined_call_operand.vmem [shape: bf16[2,16,48], index: 8, kind: output, shape index: {0}]   ;;  %s4422_s9 = inlined_call_operand.vmem [shape: bf16[2,16,16], index: 9, kind: output, shape index: {1}]  }
   0x1 LB: > { %s3039_s10 = sadd.s32 4294967295, %s3766_s30   ;;  %p3043_p0 = scmp.ge.s32.totalorder %s3766_s30, 1  ;;  %s3766_s30 = sphi %s3820_s30, %s20_s30  }
   0x2   : > { %p290_p1 = scmp.lt.s32.totalorder %s3766_s30, 3 }
   0x4   : > { %p291_p2 = pnand %p3043_p0, %p290_p1 }
   0x5   : > { %v358_v0 = vld [vmem:[%s4414_s1] sm:$0x3] (!%p291_p2)  ;;  %vm372_vm0 = vcmask (!%p291_p2), 1041408   ;;  %p331_p3 = scmp.lt.s32.totalorder (!%p291_p2), %s3039_s10, 1  ;;  %vm359_vm1 = vcmask (!%p291_p2), 31744   ;;  %v3721_v13 = vld [vmem:[%s4416_s3 + $0x8] sm:$0xff] (!%p291_p2)   ;;  %v2784_v16 = vlaneseq (!%p291_p2) }
   0x6   : > { %294 = sbr.rel (%p291_p2) target bundleno = 714 (0x2ca), region = 52  ;;  %3709 = vmatprep.subr.msk.bf16.mxu0 (!%p291_p2), %vm372_vm0, %v358_v0  ;;  %v374_v1 = vsel (!%p291_p2), %vm372_vm0, %v358_v0, 0  ;;  %v3768_v14 = vmov (!%p291_p2), 0.0   ;;  %vm3769_vm2 = vmmov (!%p291_p2), 0   ;;  %v3722_v15 = vld [vmem:[%s4416_s3 + $0x90] sm:$0xff] (!%p291_p2)   ;;  %vm813_vm3 = vcmask (!%p291_p2), 1044480  }
   0x7   : > { %3310 = vmatpush3.bf16.msra.mxu0 (!%p291_p2), %v374_v1  ;;  %3427 = vmatprep.subr.bf16.mxu1 (!%p291_p2), %v3768_v14  ;;  %v2785_v17 = vshrl.u32 (!%p291_p2), %v2784_v16, 7  ;;  %vm935_vm4 = vcmask (!%p291_p2), 1043456   ;;  %vm691_vm6 = vcmask (!%p291_p2), 1045504   ;;  %vm1057_vm8 = vcmask (!%p291_p2), 1042432   ;;  %v3724_v59 = vld [vmem:[%s4416_s3] sm:$0xff] (!%p291_p2)   ;;  %v3723_v1 = vld [vmem:[%s4416_s3 + $0x98] sm:$0xff] (!%p291_p2)  }
   0x8   : > { %3319 = vmatprep.subr.bf16.mxu0 (!%p291_p2), %v3768_v14  ;;  %3429 = vmatprep.mubr.msk.bf16.mxu1 (!%p291_p2), %vm3769_vm2, %v3768_v14  ;;  %vm449_vm9 = vsmask.f32 (!%p291_p2), 7424  ;;  %vm468_vm10 = vcmask (!%p291_p2), 130048   ;;  %vm567_vm11 = vcmask (!%p291_p2), 1046528   ;;  %vm626_vm12 = vsmask.f32 (!%p291_p2), 6400 }
   0x9   : > { %3428 = vmatpush3.bf16.msra.mxu1 (!%p291_p2), %v3722_v15  ;;  %v2786_v19 = vadd.s32 (!%p291_p2), 8, %v2785_v17  ;;  %vm2787_vm7 = vcmp.eq.s32.totalorder (!%p291_p2), %v2785_v17, 0  ;;  %vm994_vm13 = vsmask.f32 (!%p291_p2), 3328  ;;  %vm1116_vm14 = vsmask.f32 (!%p291_p2), 2304 }
   0xa   : > { %3433 = vmatprep.subr.bf16.mxu1 (!%p291_p2), %v3768_v14  ;;  %vm1238_vm15 = vsmask.f32 (!%p291_p2), 1280 }
   0xb   : > { %vm2815_vm5 = vcmp.eq.s32.totalorder (!%p291_p2), %v2786_v19, 15 }
   0xd   : > { %s4424_s10 = smov (!%p331_p3, %s3039_s10), 1 }
   0xe   : > { %s3710_s13 = smul.u32 56, %s4424_s10  ;;  %s3218_s25 = sshll.u32 %s4424_s10, 3 }
   0xf   : > { %s345_s28 = scalar_lea.vmem %s4422_s9, %s3218_s25  ;;  %s340_s15 = scalar_lea.vmem %s4421_s8, %s3218_s25 }
  0x10   : > { %s335_s16 = scalar_lea.vmem %s4413_s0, %s3710_s13 }
  0x11   : > { %v347_v2 = vld [vmem:[%s335_s16] sm:$0xff]  ;;  %v348_v3 = vld [vmem:[%s335_s16 + $0x8] sm:$0xff]  ;;  %v3839_v4 = vld [vmem:[%s335_s16 + $0x10] sm:$0xff] }
  0x12   : > { %v354_v5 = vpack.c.bf16 %v348_v3, %v347_v2  ;;  %v350_v6 = vld [vmem:[%s335_s16 + $0x18] sm:$0xff]  ;;  %v3841_v7 = vld [vmem:[%s335_s16 + $0x20] sm:$0xff]  ;;  %v352_v8 = vld [vmem:[%s335_s16 + $0x28] sm:$0xff]  ;;  %v2797_v22 = vrot.slane %v3839_v4, 3  ;;  %v2805_v24 = vrot.slane %v3839_v4, 2  ;;  %v2821_v26 = vrot.slane %v3839_v4, 4 }
  0x13   : > { %v355_v9 = vpack.c.bf16 %v350_v6, %v3839_v4  ;;  %v356_v10 = vpack.c.bf16 %v352_v8, %v3841_v7  ;;  %v353_v11 = vld [vmem:[%s335_s16 + $0x30] sm:$0x3f]  ;;  %v2800_v18 = vrot.slane %v3841_v7, 3  ;;  %v2822_v20 = vrot.slane %v350_v6, 4 }
  0x14   : > { %3311 = vmatprep.mubr.msk.bf16.mxu0 %vm359_vm1, %v354_v5  ;;  %v357_v12 = vpack.c.bf16 %v353_v11, %v353_v11  ;;  %v2824_v21 = vrot.slane %v3841_v7, 4  ;;  %v2798_v23 = vrot.slane %v350_v6, 3  ;;  %v2806_v25 = vrot.slane %v350_v6, 2 }
  0x15   : > { %3312 = vmatmul.mubr.msk.bf16.vlgmr.msra.gmra.mrb[0].mxu0 %vm359_vm1, %v355_v9  ;;  %v2808_v31 = vrot.slane %v3841_v7, 2  ;;  %v3874_v32 = vsel %vm935_vm4, %v2821_v26, %v2822_v20 }
  0x16   : > { %3315 = vmatprep.mubr.msk.bf16.mxu0 %vm359_vm1, %v356_v10  ;;  %3320 = vmatpush3.bf16.msra.mxu0 %v3721_v13  ;;  %v2801_v27 = vsel %vm813_vm3, %v2798_v23, %v2800_v18  ;;  %v2825_v28 = vsel %vm935_vm4, %v2822_v20, %v2824_v21  ;;  %v2807_v29 = vsel %vm691_vm6, %v2805_v24, %v2806_v25  ;;  %v2844_v35 = vrot.slane %v3874_v32, 5  ;;  %v3726_v21 = vld [vmem:[%s4416_s3 + $0x10] sm:$0xff]  }
  0x17   : > { %3325 = vmatprep.subr.bf16.mxu0 %v3768_v14  ;;  %v2799_v30 = vsel %vm813_vm3, %v2797_v22, %v2798_v23  ;;  %v3876_v33 = vsel %vm2815_vm5, %v2801_v27, %v2825_v28  ;;  %v3883_v37 = vsel %vm691_vm6, %v2806_v25, %v2808_v31  ;;  %vm1360_vm5 = vsmask.f32 256 }
  0x18   : > { %v3878_v34 = vsel %vm2787_vm7, %v2799_v30, %v2807_v29  ;;  %v2845_v36 = vrot.slane %v3876_v33, 5  ;;  %v2834_v39 = vrot.slane %v3883_v37, 5  ;;  %vm750_vm7 = vsmask.f32 5376 }
  0x19   : > { %v2833_v38 = vrot.slane %v3878_v34, 5 }
  0x1a   : > { %v2846_v40 = vsel %vm1057_vm8, %v2844_v35, %v2845_v36 }
  0x1b   : > { %v2835_v41 = vsel %vm1057_vm8, %v2833_v38, %v2834_v39 }
  0x1c   : > { %v2840_v42 = vmax.f32 %v350_v6, %v2835_v41 }
  0x1d   : > { %3316 = vmatmul.mubr.msk.bf16.gmra.mrb[4].mxu0 %vm359_vm1, %v357_v12 }
  0x1e   : > { %3321 = vmatprep.mubr.msk.bf16.mxu0 %vm3769_vm2, %v3768_v14  ;;  %v3897_v43 = vmax.f32 %v2840_v42, %v2846_v40 }
  0xe8   : > { %v3313_v44 = vpop.f32.mrb[0].mxu0 }
  0xe9   : > { %v410_v45 = vpop.f32.mrb[1].mxu0 }
  0xea   : > { %v3314_v46 = vpop.f32.mrb[2].mxu0 }
  0xeb   : > { %v3899_v47 = vpack.c.bf16 %v3314_v46, %v3313_v44  ;;  %v413_v48 = vpop.f32.mrb[3].mxu0  ;;  %v3725_v44 = vld [vmem:[%s4416_s3 + $0xa0] sm:$0xff]  }
  0xec   : > { %v3901_v49 = vpack.c.bf16 %v413_v48, %v410_v45 }
  0xed   : > { %v3907_v51 = vshll.u32 %v3899_v47, 16  ;;  %v569_v63 = vrot.slane %v3899_v47, 1  ;;  %v3932_v2 = vshrl.u32 %v3899_v47, 16  ;;  %v693_v45 = vrot.slane %v3899_v47, 2 }
  0xee   : > { %v3904_v50 = vshll.u32 %v3901_v49, 16  ;;  %v3910_v53 = vshrl.u32 %v3901_v49, 16  ;;  %v568_v26 = vrot.slane %v3901_v49, 1 }
  0xef   : > { %v460_v58 = vrot.slane %v3907_v51, 1  ;;  %v998_v10 = vrot.slane %v3932_v2, 4  ;;  %v999_v11 = vrot.slane %v3907_v51, 5  ;;  %v632_v19 = vrot.slane %v3932_v2, 1 }
  0xf0   : > { %v3317_v52 = vpop.f32.mrb[4].mxu0  ;;  %v455_v54 = vrot.slane %v3904_v50, 1  ;;  %v873_v8 = vrot.slane %v3910_v53, 3  ;;  %v874_v9 = vrot.slane %v3904_v50, 4  ;;  %v633_v20 = vrot.slane %v3907_v51, 2 }
  0xf1   : > { %v426_v55 = vpop.f32.mrb[5].mxu0  ;;  %v1000_v17 = vor.u32 %v999_v11, %v998_v10  ;;  %v995_v23 = vrot.slane %v3910_v53, 4  ;;  %v996_v24 = vrot.slane %v3904_v50, 5  ;;  %v1120_v27 = vrot.slane %v3932_v2, 5 }
  0xf2   : > { %v3318_v56 = vpop.f32.mrb[6].mxu0  ;;  %v456_v57 = vor.u32 %v455_v54, %v3910_v53  ;;  %v3955_v16 = vor.u32 %v874_v9, %v873_v8  ;;  %v1121_v28 = vrot.slane %v3907_v51, 6  ;;  %v3977_v41 = vpack.c.bf16 %v3317_v52, %v3317_v52 }
  0xf3   : > { %v429_v60 = vpop.f32.mrb[7].mxu0  ;;  %v997_v30 = vor.u32 %v996_v24, %v995_v23  ;;  %v3979_v42 = vor.u32 %v633_v20, %v632_v19  ;;  %v1117_v54 = vrot.slane %v3910_v53, 5  ;;  %v1362_v20 = vrot.slane %v3932_v2, 7 }
  0xf4   : > { %v3918_v61 = vpack.c.bf16 %v429_v60, %v426_v55  ;;  %v461_v62 = vsel %vm449_vm9, %v456_v57, %v460_v58  ;;  %v1122_v46 = vor.u32 %v1121_v28, %v1120_v27  ;;  %v1118_v55 = vrot.slane %v3904_v50, 6  ;;  %v3728_v27 = vld [vmem:[%s4416_s3 + $0x18] sm:$0xff]  }
  0xf5   : > { %3322 = vmatmul.mubr.msk.bf16.vlgmr.msra.gmra.mrb[8].mxu0 %vm468_vm10, %v461_v62  ;;  %v3989_v48 = vsel %vm994_vm13, %v997_v30, %v1000_v17  ;;  %v570_v57 = vsel %vm567_vm11, %v568_v26, %v569_v63  ;;  %v1243_v60 = vrot.slane %v3907_v51, 7  ;;  %v2405_v9 = vshll.u32 %v3977_v41, 16 }
  0xf6   : > { %v1536_v0 = vrot.slane %v3918_v61, 1  ;;  %3326 = vmatpush3.bf16.msra.mxu0 %v3724_v59  ;;  %3327 = vmatprep.mubr.msk.bf16.mxu0 %vm3769_vm2, %v3768_v14  ;;  %v3939_v5 = vshll.u32 %v3918_v61, 16  ;;  %v3942_v6 = vshrl.u32 %v3918_v61, 16  ;;  %v1242_v59 = vrot.slane %v3932_v2, 6 }
  0xf7   : > { %3331 = vmatprep.subr.bf16.mxu0 %v3768_v14  ;;  %v1654_v19 = vrot.slane %v3918_v61, 2  ;;  %v1361_v26 = vrot.slane %v3910_v53, 7 }
  0xf8   : > { %v1537_v3 = vsel %vm567_vm11, %v569_v63, %v1536_v0  ;;  %v1595_v12 = vrot.slane %v3942_v6, 1  ;;  %v1596_v13 = vrot.slane %v3939_v5, 2  ;;  %v1943_v15 = vrot.slane %v3942_v6, 4 }
  0xf9   : > { %3430 = vmatmul.mubr.msk.bf16.vlgmr.msra.gmra.mrb[0].mxu1 %vm468_vm10, %v1537_v3  ;;  %v1944_v18 = vrot.slane %v3939_v5, 5  ;;  %v2059_v31 = vrot.slane %v3942_v6, 5  ;;  %v2060_v40 = vrot.slane %v3939_v5, 6  ;;  %v2175_v3 = vrot.slane %v3942_v6, 6 }
  0xfa   : > { %3434 = vmatpush3.bf16.msra.mxu1 %v3723_v1  ;;  %3435 = vmatprep.mubr.msk.bf16.mxu1 %vm3769_vm2, %v3768_v14  ;;  %v3965_v25 = vor.u32 %v1596_v13, %v1595_v12  ;;  %v1119_v1 = vor.u32 %v1118_v55, %v1117_v54  ;;  %v2176_v8 = vrot.slane %v3939_v5, 7  ;;  %v1711_v63 = vrot.slane %v3942_v6, 2 }
  0xfb   : > { %3439 = vmatprep.subr.bf16.mxu1 %v3768_v14  ;;  %v1945_v22 = vor.u32 %v1944_v18, %v1943_v15  ;;  %v2061_v52 = vor.u32 %v2060_v40, %v2059_v31  ;;  %v1712_v10 = vrot.slane %v3939_v5, 3  ;;  %v1244_v11 = vor.u32 %v1243_v60, %v1242_v59 }
  0xfc   : > { %v1598_v56 = vsel %vm626_vm12, %v3979_v42, %v3965_v25  ;;  %v4012_v12 = vsel %vm1116_vm14, %v1119_v1, %v1122_v46  ;;  %v2177_v13 = vor.u32 %v2176_v8, %v2175_v3  ;;  %v1239_v15 = vrot.slane %v3910_v53, 6 }
  0xfd   : > { %v3973_v29 = vsel %vm994_vm13, %v1000_v17, %v1945_v22  ;;  %v4001_v62 = vsel %vm1116_vm14, %v1122_v46, %v2061_v52  ;;  %v1240_v17 = vrot.slane %v3904_v50, 7  ;;  %v2522_v18 = vshrl.u32 %v3977_v41, 16 }
  0xfe   : > { %v1770_v22 = vrot.slane %v3918_v61, 3  ;;  %v4022_v23 = vsel %vm1238_vm15, %v1244_v11, %v2177_v13  ;;  %v1713_v28 = vor.u32 %v1712_v10, %v1711_v63  ;;  %v1363_v31 = vor.u32 %v1362_v20, %v3907_v51  ;;  %v3727_v63 = vld [vmem:[%s4416_s3 + $0xa8] sm:$0xff]  }
  0xff   : > { %v1241_v24 = vor.u32 %v1240_v17, %v1239_v15  ;;  %v1478_v40 = vrot.slane %v3939_v5, 1  ;;  %v2407_v46 = vrot.slane %v2405_v9, 1  ;;  %v2465_v52 = vrot.slane %v3977_v41, 1 }
 0x100   : > { %v1474_v54 = vor.u32 %v3932_v2, %v460_v58  ;;  %v2524_v60 = vrot.slane %v2522_v18, 1  ;;  %v2525_v58 = vrot.slane %v2405_v9, 2  ;;  %v2583_v8 = vrot.slane %v3977_v41, 2 }
 0x101   : > { %3328 = vmatmul.mubr.msk.bf16.vlgmr.msra.gmra.mrb[8].mxu0 %vm468_vm10, %v3901_v49  ;;  %v2403_v59 = vor.u32 %v3942_v6, %v1478_v40  ;;  %v4049_v1 = vsel %vm567_vm11, %v1536_v0, %v2465_v52  ;;  %v2640_v10 = vrot.slane %v2522_v18, 2  ;;  %v2641_v0 = vrot.slane %v2405_v9, 3  ;;  %v3732_v52 = vld [vmem:[%s4416_s3 + $0x28] sm:$0xff]  }
 0x102   : > { %3332 = vmatpush3.bf16.msra.mxu0 %v3726_v21  ;;  %3333 = vmatprep.mubr.msk.bf16.mxu0 %vm3769_vm2, %v3768_v14  ;;  %v2291_v21 = vrot.slane %v3942_v6, 7  ;;  %v4052_v3 = vsel %vm449_vm9, %v1474_v54, %v1478_v40  ;;  %v627_v13 = vrot.slane %v3910_v53, 1  ;;  %v2526_v15 = vor.u32 %v2525_v58, %v2524_v60  ;;  %v3729_v40 = vld [vmem:[%s4416_s3 + $0xb0] sm:$0xff]  }
 0x103   : > { %3337 = vmatprep.subr.bf16.mxu0 %v3768_v14  ;;  %v4067_v17 = vsel %vm691_vm6, %v1654_v19, %v2583_v8  ;;  %v752_v58 = vrot.slane %v3904_v50, 3 }
 0x104   : > { %v2292_v30 = vor.u32 %v2291_v21, %v3939_v5  ;;  %v628_v21 = vrot.slane %v3904_v50, 2  ;;  %v3734_v50 = vld [vmem:[%s4416_s3 + $0x30] sm:$0xff]  }
 0x105   : > { %3436 = vmatmul.mubr.msk.bf16.vlgmr.msra.gmra.mrb[0].mxu1 %vm468_vm10, %v1598_v56  ;;  %v4042_v56 = vsel %vm1360_vm5, %v1361_v26, %v1363_v31  ;;  %v754_v26 = vrot.slane %v3932_v2, 2 }
 0x106   : > { %3440 = vmatpush3.bf16.msra.mxu1 %v3725_v44  ;;  %3441 = vmatprep.mubr.msk.bf16.mxu1 %vm3769_vm2, %v3768_v14  ;;  %v4032_v44 = vsel %vm1238_vm15, %v1241_v24, %v1244_v11  ;;  %v4039_v55 = vsel %vm1360_vm5, %v1362_v20, %v2292_v30  ;;  %v2699_v11 = vrot.slane %v3977_v41, 3  ;;  %v1655_v20 = vsel %vm691_vm6, %v693_v45, %v1654_v19  ;;  %v3730_v30 = vld [vmem:[%s4416_s3 + $0x20] sm:$0xff]  }
 0x107   : > { %3445 = vmatprep.subr.bf16.mxu1 %v3768_v14  ;;  %v2642_v24 = vor.u32 %v2641_v0, %v2640_v10  ;;  %v4081_v41 = vsel %vm626_vm12, %v3965_v25, %v2526_v15  ;;  %v629_v19 = vor.u32 %v628_v21, %v627_v13  ;;  %v1828_v10 = vrot.slane %v3939_v5, 4  ;;  %v3736_v5 = vld [vmem:[%s4416_s3 + $0x38] sm:$0xff]  }
 0x108   : > { %v4076_v9 = vsel %vm813_vm3, %v1770_v22, %v2699_v11  ;;  %v876_v0 = vrot.slane %v3932_v2, 3  ;;  %v814_v2 = vrot.slane %v3901_v49, 3  ;;  %v937_v21 = vrot.slane %v3899_v47, 4 }
 0x109   : > { %v4086_v18 = vsel %vm750_vm7, %v1713_v28, %v2642_v24  ;;  %v635_v25 = vsel %vm626_vm12, %v629_v19, %v3979_v42  ;;  %v692_v42 = vrot.slane %v3901_v49, 2  ;;  %v3735_v24 = vld [vmem:[%s4416_s3 + $0xc8] sm:$0xff]  }
 0x10b   : > { %v694_v54 = vsel %vm691_vm6, %v692_v42, %v693_v45  ;;  %v751_v45 = vrot.slane %v3910_v53, 2  ;;  %vm872_vm6 = vsmask.f32 4352  ;;  %v3739_v42 = vld [vmem:[%s4416_s3 + $0xd8] sm:$0xff]  }
 0x10d   : > { %3334 = vmatmul.mubr.msk.bf16.vlgmr.msra.gmra.mrb[8].mxu0 %vm468_vm10, %v570_v57  ;;  %v4061_v57 = vsel %vm449_vm9, %v2403_v59, %v2407_v46  ;;  %v3731_v59 = vld [vmem:[%s4416_s3 + $0xb8] sm:$0xff]   ;;  %v753_v8 = vor.u32 %v752_v58, %v751_v45  ;;  %v1058_v45 = vrot.slane %v3901_v49, 5 }
 0x10e   : > { %3338 = vmatpush3.bf16.msra.mxu0 %v3728_v27  ;;  %3339 = vmatprep.mubr.msk.bf16.mxu0 %vm3769_vm2, %v3768_v14  ;;  %v755_v27 = vrot.slane %v3907_v51, 3 }
 0x10f   : > { %3343 = vmatprep.subr.bf16.mxu0 %v3768_v14 }
 0x110   : > { %v756_v31 = vor.u32 %v755_v27, %v754_v26  ;;  %v3738_v26 = vld [vmem:[%s4416_s3 + $0x40] sm:$0xff]  }
 0x111   : > { %3442 = vmatmul.mubr.msk.bf16.vlgmr.msra.gmra.mrb[0].mxu1 %vm468_vm10, %v1655_v20  ;;  %v1886_v20 = vrot.slane %v3918_v61, 4 }
 0x112   : > { %3446 = vmatpush3.bf16.msra.mxu1 %v3727_v63  ;;  %3447 = vmatprep.mubr.msk.bf16.mxu1 %vm3769_vm2, %v3768_v14  ;;  %v1714_v46 = vsel %vm750_vm7, %v756_v31, %v1713_v28  ;;  %v815_v28 = vrot.slane %v3899_v47, 3  ;;  %v1827_v63 = vrot.slane %v3942_v6, 3  ;;  %v757_v53 = vsel %vm750_vm7, %v753_v8, %v756_v31  ;;  %v3733_v6 = vld [vmem:[%s4416_s3 + $0xc0] sm:$0xff]   ;;  %v3744_v8 = vld [vmem:[%s4416_s3 + $0x58] sm:$0xff]  }
 0x113   : > { %3451 = vmatprep.subr.bf16.mxu1 %v3768_v14  ;;  %v1887_v19 = vsel %vm935_vm4, %v937_v21, %v1886_v20  ;;  %v3749_v20 = vld [vmem:[%s4416_s3 + $0x100] sm:$0xff]  }
 0x114   : > { %v1771_v60 = vsel %vm813_vm3, %v815_v28, %v1770_v22  ;;  %v877_v22 = vrot.slane %v3907_v51, 4  ;;  %v1829_v11 = vor.u32 %v1828_v10, %v1827_v63  ;;  %v816_v15 = vsel %vm813_vm3, %v814_v2, %v815_v28  ;;  %v3747_v2 = vld [vmem:[%s4416_s3 + $0xf8] sm:$0xff]  }
 0x115   : > { %v2118_v10 = vrot.slane %v3918_v61, 6  ;;  %vm1301_vm3 = vcmask 1040384  }
 0x116   : > { %v878_v13 = vor.u32 %v877_v22, %v876_v0  ;;  %v1181_v0 = vrot.slane %v3899_v47, 6  ;;  %v3743_v22 = vld [vmem:[%s4416_s3 + $0xe8] sm:$0xff]  }
 0x118   : > { %v1830_v51 = vsel %vm872_vm6, %v878_v13, %v1829_v11  ;;  %v879_v27 = vsel %vm872_vm6, %v3955_v16, %v878_v13  ;;  %v936_v16 = vrot.slane %v3901_v49, 4  ;;  %v3745_v11 = vld [vmem:[%s4416_s3 + $0xf0] sm:$0xff]   ;;  %v3748_v13 = vld [vmem:[%s4416_s3 + $0x68] sm:$0xff]  }
 0x119   : > { %3340 = vmatmul.mubr.msk.bf16.vlgmr.msra.gmra.mrb[8].mxu0 %vm468_vm10, %v635_v25  ;;  %v3740_v25 = vld [vmem:[%s4416_s3 + $0x48] sm:$0xff]  }
 0x11a   : > { %3344 = vmatpush3.bf16.msra.mxu0 %v3730_v30  ;;  %3345 = vmatprep.mubr.msk.bf16.mxu0 %vm3769_vm2, %v3768_v14  ;;  %v3737_v30 = vld [vmem:[%s4416_s3 + $0xd0] sm:$0xff]   ;;  %v938_v31 = vsel %vm935_vm4, %v936_v16, %v937_v21  ;;  %v3752_v21 = vld [vmem:[%s4416_s3 + $0x78] sm:$0xff]   ;;  %v3212_v16 = vld [vmem:[%s4419_s6] ss:$0 sm:$0xff] }
 0x11b   : > { %3349 = vmatprep.subr.bf16.mxu0 %v3768_v14 }
 0x11d   : > { %3448 = vmatmul.mubr.msk.bf16.vlgmr.msra.gmra.mrb[0].mxu1 %vm468_vm10, %v1714_v46  ;;  %v1059_v46 = vrot.slane %v3899_v47, 5 }
 0x11e   : > { %3452 = vmatpush3.bf16.msra.mxu1 %v3729_v40  ;;  %3453 = vmatprep.mubr.msk.bf16.mxu1 %vm3769_vm2, %v3768_v14  ;;  %v2002_v40 = vrot.slane %v3918_v61, 5 }
 0x11f   : > { %3457 = vmatprep.subr.bf16.mxu1 %v3768_v14 }
 0x125   : > { %3346 = vmatmul.mubr.msk.bf16.vlgmr.msra.gmra.mrb[8].mxu0 %vm468_vm10, %v694_v54 }
 0x126   : > { %3350 = vmatpush3.bf16.msra.mxu0 %v3732_v52  ;;  %3351 = vmatprep.mubr.msk.bf16.mxu0 %vm3769_vm2, %v3768_v14  ;;  %v2003_v52 = vsel %vm1057_vm8, %v1059_v46, %v2002_v40 }
 0x127   : > { %3355 = vmatprep.subr.bf16.mxu0 %v3768_v14 }
 0x129   : > { %3454 = vmatmul.mubr.msk.bf16.vlgmr.msra.gmra.mrb[0].mxu1 %vm468_vm10, %v1771_v60 }
 0x12a   : > { %3458 = vmatpush3.bf16.msra.mxu1 %v3731_v59  ;;  %3459 = vmatprep.mubr.msk.bf16.mxu1 %vm3769_vm2, %v3768_v14  ;;  %v3741_v59 = vld [vmem:[%s4416_s3 + $0xe0] sm:$0xff]  }
 0x12b   : > { %3463 = vmatprep.subr.bf16.mxu1 %v3768_v14 }
 0x131   : > { %3352 = vmatmul.mubr.msk.bf16.vlgmr.msra.gmra.mrb[8].mxu0 %vm468_vm10, %v757_v53  ;;  %v3746_v53 = vld [vmem:[%s4416_s3 + $0x60] sm:$0xff]  }
 0x132   : > { %3356 = vmatpush3.bf16.msra.mxu0 %v3734_v50  ;;  %3357 = vmatprep.mubr.msk.bf16.mxu0 %vm3769_vm2, %v3768_v14  ;;  %v2119_v50 = vsel %vm372_vm0, %v1181_v0, %v2118_v10 }
 0x133   : > { %3361 = vmatprep.subr.bf16.mxu0 %v3768_v14 }
 0x135   : > { %3460 = vmatmul.mubr.msk.bf16.vlgmr.msra.gmra.mrb[0].mxu1 %vm468_vm10, %v1830_v51  ;;  %v2234_v51 = vrot.slane %v3918_v61, 7 }
 0x136   : > { %3464 = vmatpush3.bf16.msra.mxu1 %v3733_v6  ;;  %3465 = vmatprep.mubr.msk.bf16.mxu1 %vm3769_vm2, %v3768_v14 }
 0x137   : > { %3469 = vmatprep.subr.bf16.mxu1 %v3768_v14 }
 0x13d   : > { %3358 = vmatmul.mubr.msk.bf16.vlgmr.msra.gmra.mrb[8].mxu0 %vm468_vm10, %v816_v15  ;;  %v3750_v15 = vld [vmem:[%s4416_s3 + $0x70] sm:$0xff]  }
 0x13e   : > { %3362 = vmatpush3.bf16.msra.mxu0 %v3736_v5  ;;  %3363 = vmatprep.mubr.msk.bf16.mxu0 %vm3769_vm2, %v3768_v14 }
 0x13f   : > { %3367 = vmatprep.subr.bf16.mxu0 %v3768_v14 }
 0x141   : > { %3466 = vmatmul.mubr.msk.bf16.vlgmr.msra.gmra.mrb[0].mxu1 %vm468_vm10, %v1887_v19  ;;  %v3753_v19 = vld [vmem:[%s4416_s3 + $0x110] sm:$0xff]  }
 0x142   : > { %3470 = vmatpush3.bf16.msra.mxu1 %v3735_v24  ;;  %3471 = vmatprep.mubr.msk.bf16.mxu1 %vm3769_vm2, %v3768_v14 }
 0x143   : > { %3475 = vmatprep.subr.bf16.mxu1 %v3768_v14 }
 0x149   : > { %3364 = vmatmul.mubr.msk.bf16.vlgmr.msra.gmra.mrb[8].mxu0 %vm468_vm10, %v879_v27 }
 0x14a   : > { %3368 = vmatpush3.bf16.msra.mxu0 %v3738_v26  ;;  %3369 = vmatprep.mubr.msk.bf16.mxu0 %vm3769_vm2, %v3768_v14  ;;  %v3757_v26 = vld [vmem:[%s4416_s3 + $0x120] sm:$0xff]  }
 0x14b   : > { %3373 = vmatprep.subr.bf16.mxu0 %v3768_v14 }
 0x14d   : > { %3472 = vmatmul.mubr.msk.bf16.vlgmr.msra.gmra.mrb[0].mxu1 %vm468_vm10, %v3973_v29  ;;  %v2839_v29 = vmax.f32 %v3839_v4, %v2833_v38  ;;  %v3742_v4 = vld [vmem:[%s4416_s3 + $0x50] sm:$0xff]   ;;  %v2841_v38 = vmax.f32 %v3841_v7, %v2834_v39 }
 0x14e   : > { %3476 = vmatpush3.bf16.msra.mxu1 %v3737_v30  ;;  %3477 = vmatprep.mubr.msk.bf16.mxu1 %vm3769_vm2, %v3768_v14 }
 0x14f   : > { %3481 = vmatprep.subr.bf16.mxu1 %v3768_v14  ;;  %v2850_v34 = vmax.f32 %v2839_v29, %v2844_v35  ;;  %v2852_v32 = vmax.f32 %v2841_v38, %v2845_v36 }
 0x151   : > { %v2853_v54 = vpack.c.bf16 %v3897_v43, %v2850_v34  ;;  %v2854_v37 = vpack.c.bf16 %v2852_v32, %v2852_v32  ;;  %v3207_v32 = vld [vmem:[%s4417_s4] ss:$0 sm:$0xff] }
 0x153   : > { %v2857_v35 = vshrl.u32 %v2853_v54, 16  ;;  %v2860_v28 = vshll.u32 %v2853_v54, 16  ;;  %v2865_v33 = vshrl.u32 %v2854_v37, 16  ;;  %v2868_v36 = vshll.u32 %v2854_v37, 16 }
 0x155   : > { %3370 = vmatmul.mubr.msk.bf16.vlgmr.msra.gmra.mrb[8].mxu0 %vm468_vm10, %v938_v31  ;;  %v2859_v7 = vrot.slane %v2857_v35, 1  ;;  %v2862_v39 = vrot.slane %v2860_v28, 2  ;;  %v2870_v60 = vrot.slane %v2868_v36, 2 }
 0x156   : > { %3374 = vmatpush3.bf16.msra.mxu0 %v3740_v25  ;;  %3375 = vmatprep.mubr.msk.bf16.mxu0 %vm3769_vm2, %v3768_v14 }
 0x157   : > { %3379 = vmatprep.subr.bf16.mxu0 %v3768_v14  ;;  %v2863_v43 = vor.u32 %v2862_v39, %v2859_v7 }
 0x159   : > { %3478 = vmatmul.mubr.msk.bf16.vlgmr.msra.gmra.mrb[0].mxu1 %vm468_vm10, %v2003_v52 }
 0x15a   : > { %3482 = vmatpush3.bf16.msra.mxu1 %v3739_v42  ;;  %3483 = vmatprep.mubr.msk.bf16.mxu1 %vm3769_vm2, %v3768_v14 }
 0x15b   : > { %3487 = vmatprep.subr.bf16.mxu1 %v3768_v14 }
 0x161   : > { %3376 = vmatmul.mubr.msk.bf16.vlgmr.msra.gmra.mrb[8].mxu0 %vm468_vm10, %v3989_v48  ;;  %v2867_v48 = vrot.slane %v2865_v33, 1 }
 0x162   : > { %3380 = vmatpush3.bf16.msra.mxu0 %v3742_v4  ;;  %3381 = vmatprep.mubr.msk.bf16.mxu0 %vm3769_vm2, %v3768_v14 }
 0x163   : > { %3385 = vmatprep.subr.bf16.mxu0 %v3768_v14  ;;  %v2871_v58 = vor.u32 %v2870_v60, %v2867_v48 }
 0x165   : > { %3484 = vmatmul.mubr.msk.bf16.vlgmr.msra.gmra.mrb[0].mxu1 %vm468_vm10, %v4001_v62  ;;  %v4239_v63 = vsel %vm626_vm12, %v2863_v43, %v2871_v58  ;;  %v1060_v62 = vsel %vm1057_vm8, %v1058_v45, %v1059_v46 }
 0x166   : > { %3488 = vmatpush3.bf16.msra.mxu1 %v3741_v59  ;;  %3489 = vmatprep.mubr.msk.bf16.mxu1 %vm3769_vm2, %v3768_v14  ;;  %v3208_v59 = vld [vmem:[%s4418_s5] ss:$0 sm:$0xff] }
 0x167   : > { %3493 = vmatprep.subr.bf16.mxu1 %v3768_v14 }
 0x16d   : > { %3382 = vmatmul.mubr.msk.bf16.vlgmr.msra.gmra.mrb[8].mxu0 %vm468_vm10, %v1060_v62 }
 0x16e   : > { %3386 = vmatpush3.bf16.msra.mxu0 %v3744_v8  ;;  %3387 = vmatprep.mubr.msk.bf16.mxu0 %vm3769_vm2, %v3768_v14 }
 0x16f   : > { %3391 = vmatprep.subr.bf16.mxu0 %v3768_v14 }
 0x171   : > { %3490 = vmatmul.mubr.msk.bf16.vlgmr.msra.gmra.mrb[0].mxu1 %vm468_vm10, %v2119_v50 }
 0x172   : > { %3494 = vmatpush3.bf16.msra.mxu1 %v3743_v22  ;;  %3495 = vmatprep.mubr.msk.bf16.mxu1 %vm3769_vm2, %v3768_v14 }
 0x173   : > { %3499 = vmatprep.subr.bf16.mxu1 %v3768_v14 }
 0x179   : > { %3388 = vmatmul.mubr.msk.bf16.vlgmr.msra.gmra.mrb[8].mxu0 %vm468_vm10, %v4012_v12  ;;  %v1180_v12 = vrot.slane %v3901_v49, 6 }
 0x17a   : > { %3392 = vmatpush3.bf16.msra.mxu0 %v3746_v53  ;;  %3393 = vmatprep.mubr.msk.bf16.mxu0 %vm3769_vm2, %v3768_v14 }
 0x17b   : > { %3397 = vmatprep.subr.bf16.mxu0 %v3768_v14  ;;  %v1182_v6 = vsel %vm372_vm0, %v1180_v12, %v1181_v0 }
 0x17d   : > { %3496 = vmatmul.mubr.msk.bf16.vlgmr.msra.gmra.mrb[0].mxu1 %vm468_vm10, %v4022_v23  ;;  %v1303_v23 = vrot.slane %v3899_v47, 7 }
 0x17e   : > { %3500 = vmatpush3.bf16.msra.mxu1 %v3745_v11  ;;  %3501 = vmatprep.mubr.msk.bf16.mxu1 %vm3769_vm2, %v3768_v14 }
 0x17f   : > { %3505 = vmatprep.subr.bf16.mxu1 %v3768_v14  ;;  %v2235_v5 = vsel %vm1301_vm3, %v1303_v23, %v2234_v51 }
 0x185   : > { %3394 = vmatmul.mubr.msk.bf16.vlgmr.msra.gmra.mrb[8].mxu0 %vm468_vm10, %v1182_v6 }
 0x186   : > { %3398 = vmatpush3.bf16.msra.mxu0 %v3748_v13  ;;  %3399 = vmatprep.mubr.msk.bf16.mxu0 %vm3769_vm2, %v3768_v14 }
 0x187   : > { %3403 = vmatprep.subr.bf16.mxu0 %v3768_v14 }
 0x189   : > { %3502 = vmatmul.mubr.msk.bf16.vlgmr.msra.gmra.mrb[0].mxu1 %vm468_vm10, %v2235_v5 }
 0x18a   : > { %3506 = vmatpush3.bf16.msra.mxu1 %v3747_v2  ;;  %3507 = vmatprep.mubr.msk.bf16.mxu1 %vm3769_vm2, %v3768_v14 }
 0x18b   : > { %3511 = vmatprep.subr.bf16.mxu1 %v3768_v14 }
 0x191   : > { %3400 = vmatmul.mubr.msk.bf16.vlgmr.msra.gmra.mrb[8].mxu0 %vm468_vm10, %v4032_v44  ;;  %v1302_v44 = vrot.slane %v3901_v49, 7  ;;  %v3754_v49 = vld [vmem:[%s4416_s3 + $0x80] sm:$0xff]  }
 0x192   : > { %3404 = vmatpush3.bf16.msra.mxu0 %v3750_v15  ;;  %3405 = vmatprep.mubr.msk.bf16.mxu0 %vm3769_vm2, %v3768_v14 }
 0x193   : > { %3409 = vmatprep.subr.bf16.mxu0 %v3768_v14  ;;  %v1304_v24 = vsel %vm1301_vm3, %v1302_v44, %v1303_v23 }
 0x195   : > { %3508 = vmatmul.mubr.msk.bf16.vlgmr.msra.gmra.mrb[0].mxu1 %vm468_vm10, %v4039_v55  ;;  %v3751_v55 = vld [vmem:[%s4416_s3 + $0x108] sm:$0xff]  }
 0x196   : > { %3512 = vmatpush3.bf16.msra.mxu1 %v3749_v20  ;;  %3513 = vmatprep.mubr.msk.bf16.mxu1 %vm3769_vm2, %v3768_v14 }
 0x197   : > { %3517 = vmatprep.subr.bf16.mxu1 %v3768_v14 }
 0x19d   : > { %3406 = vmatmul.mubr.msk.bf16.vlgmr.msra.gmra.mrb[8].mxu0 %vm468_vm10, %v1304_v24 }
 0x19e   : > { %3410 = vmatpush3.bf16.msra.mxu0 %v3752_v21  ;;  %3411 = vmatprep.mubr.msk.bf16.mxu0 %vm3769_vm2, %v3768_v14 }
 0x19f   : > { %3415 = vmatprep.subr.bf16.mxu0 %v3768_v14 }
 0x1a1   : > { %3514 = vmatmul.mubr.msk.bf16.vlgmr.msra.gmra.mrb[0].mxu1 %vm468_vm10, %v3918_v61  ;;  %v3756_v61 = vld [vmem:[%s4416_s3 + $0x88] sm:$0xff]  }
 0x1a2   : > { %3518 = vmatpush3.bf16.msra.mxu1 %v3751_v55  ;;  %3519 = vmatprep.mubr.msk.bf16.mxu1 %vm3769_vm2, %v3768_v14 }
 0x1a3   : > { %3523 = vmatprep.subr.bf16.mxu1 %v3768_v14 }
 0x1a9   : > { %3412 = vmatmul.mubr.msk.bf16.vlgmr.msra.gmra.mrb[8].mxu0 %vm468_vm10, %v4042_v56  ;;  %v3755_v56 = vld [vmem:[%s4416_s3 + $0x118] sm:$0xff]  }
 0x1aa   : > { %3416 = vmatpush3.bf16.msra.mxu0 %v3754_v49  ;;  %3417 = vmatprep.mubr.msk.bf16.mxu0 %vm3769_vm2, %v3768_v14 }
 0x1ab   : > { %3421 = vmatprep.subr.bf16.mxu0 %v3768_v14 }
 0x1ad   : > { %3520 = vmatmul.mubr.msk.bf16.vlgmr.msra.gmra.mrb[0].mxu1 %vm468_vm10, %v4061_v57 }
 0x1ae   : > { %3524 = vmatpush3.bf16.msra.mxu1 %v3753_v19  ;;  %3525 = vmatprep.mubr.msk.bf16.mxu1 %vm3769_vm2, %v3768_v14 }
 0x1af   : > { %3529 = vmatprep.subr.bf16.mxu1 %v3768_v14 }
 0x1b5   : > { %3418 = vmatmul.mubr.msk.bf16.vlgmr.msra.gmra.mrb[8].mxu0 %vm468_vm10, %v3899_v47  ;;  %v2855_v47 = vld [vmem:[%s4415_s2] sm:$0x3] }
 0x1b6   : > { %3422 = vmatpush3.bf16.msra.mxu0 %v3756_v61  ;;  %3423 = vmatprep.mubr.msk.bf16.mxu0 %vm3769_vm2, %v3768_v14  ;;  %v2877_v57 = vsel %vm372_vm0, %v2855_v47, 0  ;;  %vm2948_vm0 = vcmask 125952  }
 0x1b7   : > { %3553 = vmatprep.subr.bf16.mxu0 %v3768_v14 }
 0x1b9   : > { %3526 = vmatmul.mubr.msk.bf16.vlgmr.msra.gmra.mrb[0].mxu1 %vm468_vm10, %v4049_v1  ;;  %v3758_v1 = vld [vmem:[%s4416_s3 + $0x128] sm:$0xff]  }
 0x1ba   : > { %3530 = vmatpush3.bf16.msra.mxu1 %v3755_v56  ;;  %3531 = vmatprep.mubr.msk.bf16.mxu1 %vm3769_vm2, %v3768_v14 }
 0x1bb   : > { %3535 = vmatprep.subr.bf16.mxu1 %v3768_v14 }
 0x1c1   : > { %3424 = vmatmul.mubr.msk.bf16.vlgmr.msra.gmra.mrb[8].mxu0 %vm468_vm10, %v4052_v3  ;;  %v3759_v3 = vld [vmem:[%s4416_s3 + $0x130] sm:$0xff]  }
 0x1c2   : > { %3554 = vmatpush3.bf16.msra.mxu0 %v2877_v57  ;;  %3555 = vmatprep.mubr.msk.bf16.mxu0 %vm3769_vm2, %v3768_v14 }
 0x1c5   : > { %3532 = vmatmul.mubr.msk.bf16.vlgmr.msra.gmra.mrb[0].mxu1 %vm468_vm10, %v4081_v41 }
 0x1c6   : > { %3536 = vmatpush3.bf16.msra.mxu1 %v3757_v26  ;;  %3537 = vmatprep.mubr.msk.bf16.mxu1 %vm3769_vm2, %v3768_v14 }
 0x1c7   : > { %3541 = vmatprep.subr.bf16.mxu1 %v3768_v14 }
 0x1c9   : > { %3556 = vmatmul.mubr.msk.bf16.vlgmr.msra.gmra.mrb[12].mxu0 %vm359_vm1, %v4239_v63  ;;  %vm2781_vm1 = vcmask 388096  }
 0x1d1   : > { %3538 = vmatmul.mubr.msk.bf16.vlgmr.msra.gmra.mrb[0].mxu1 %vm468_vm10, %v4067_v17 }
 0x1d2   : > { %3542 = vmatpush3.bf16.msra.mxu1 %v3758_v1  ;;  %3543 = vmatprep.mubr.msk.bf16.mxu1 %vm3769_vm2, %v3768_v14 }
 0x1d3   : > { %3547 = vmatprep.subr.bf16.mxu1 %v3768_v14 }
 0x1dd   : > { %3544 = vmatmul.mubr.msk.bf16.vlgmr.msra.gmra.mrb[0].mxu1 %vm468_vm10, %v4086_v18  ;;  %v3213_v18 = vld [vmem:[%s4420_s7] ss:$0 sm:$0xff] }
 0x1de   : > { %3548 = vmatpush3.bf16.msra.mxu1 %v3759_v3  ;;  %3549 = vmatprep.mubr.msk.bf16.mxu1 %vm3769_vm2, %v3768_v14 }
 0x1e9   : > { %3550 = vmatmul.mubr.msk.bf16.vlgmr.msra.gmra.mrb[0].mxu1 %vm468_vm10, %v4076_v9 }
 0x294   : > { %v1523_v17 = vpop.f32.mrb[8].mxu0 }
 0x295   : > { %v3425_v41 = vpop.f32.mrb[9].mxu0 }
 0x296   : > { %v1526_v27 = vpop.f32.mrb[10].mxu0 }
 0x297   : > { %v3426_v30 = vpop.f32.mrb[11].mxu0 }
 0x29c   : > { %v2913_v25 = vpop.f32.mrb[12].mxu0 }
 0x29d   : > { %v2927_v31 = vmul.f32 %v3212_v16, %v2913_v25  ;;  %v3557_v40 = vpop.f32.mrb[13].mxu0 }
 0x29e   : > { %v2916_v29 = vpop.f32.mrb[14].mxu0 }
 0x29f   : > { %v2936_v14 = vadd.f32 %v3213_v18, %v2927_v31  ;;  %v2928_v46 = vmul.f32 %v3212_v16, %v2916_v29  ;;  %v3558_v9 = vpop.f32.mrb[15].mxu0 }
 0x2a1   : > { %v2938_v42 = vmax.f32 %v2936_v14, 0.0  ;;  %v2937_v52 = vadd.f32 %v3213_v18, %v2928_v46 }
 0x2a3   : > { %v3222_v34 = vpack.c.bf16 %v2938_v42, %v2938_v42  ;;  %v2939_v4 = vmax.f32 %v2937_v52, 0.0 }
 0x2a5   : > { %2949 = vst.msk [vmem:[%s345_s28] sm:$0xf] %vm2948_vm0, %v3222_v34  ;;  %v3223_v38 = vpack.c.bf16 %v2939_v4, %v2939_v4 }
 0x2a7   : > { %2950 = vst.msk [vmem:[%s345_s28 + $0x4] sm:$0xf] %vm2948_vm0, %v3223_v38 }
 0x2bc   : > { %v2744_v54 = vpop.f32.mrb[0].mxu1 }
 0x2bd   : > { %v3559_v35 = vadd.f32 %v2744_v54, %v1523_v17  ;;  %v3551_v28 = vpop.f32.mrb[1].mxu1 }
 0x2be   : > { %v2747_v37 = vpop.f32.mrb[2].mxu1 }
 0x2bf   : > { %v2760_v7 = vmul.f32 %v3559_v35, %v3207_v32  ;;  %v3560_v39 = vadd.f32 %v2747_v37, %v1526_v27  ;;  %v3552_v33 = vpop.f32.mrb[3].mxu1 }
 0x2c1   : > { %v2769_v36 = vadd.f32 %v3208_v59, %v2760_v7  ;;  %v2761_v43 = vmul.f32 %v3560_v39, %v3207_v32 }
 0x2c3   : > { %v2771_v48 = vmax.f32 %v2769_v36, 0.0  ;;  %v2770_v60 = vadd.f32 %v3208_v59, %v2761_v43 }
 0x2c5   : > { %v3220_v45 = vpack.c.bf16 %v2771_v48, %v2771_v48  ;;  %v2772_v58 = vmax.f32 %v2770_v60, 0.0 }
 0x2c7   : > { %2782 = vst.msk [vmem:[%s340_s15] sm:$0xf] %vm2781_vm1, %v3220_v45  ;;  %v3221_v8 = vpack.c.bf16 %v2772_v58, %v2772_v58 }
 0x2c9   : > { %2783 = vst.msk [vmem:[%s340_s15 + $0x4] sm:$0xf] %vm2781_vm1, %v3221_v8 }
 0x2ca PF: > { %s20_s30 = sadd.s32 1, %s3766_s30  }
 0x2cb   : > { %p17_p4 = scmp.ge.s32.totalorder %s20_s30, 4  }
 0x2cd   :  { %19 = sbr.rel (!%p17_p4) target bundleno = 1 (0x1), region = 132 }

</bundles_post_ra>
